<compile_context>
chip_gen: v7x
topology: tpu7x:2x2x1
jax: 0.10.0
libtpu: 0.0.40
codegen_flags: <defaults>
</compile_context>

<pallas_src>
import jax
import jax.numpy as jnp
from jax import lax
from jax.experimental import pallas as pl
from jax.experimental.pallas import tpu as pltpu

C_OUT = 96    # logical out_channels of every conv block and the final Linear
C_PAD = 128   # lane-padded channel width used inside the kernel
KSIZE = 3     # kernel_size=3, stride=1, padding=0 (valid conv)


def _make_kernel(block_num, seq_len, l_pad, tb):
    """Fused kernel: all StackCNN blocks + masked max-pool + concat + Linear."""
    m_rows = tb * l_pad

    def kernel(*refs):
        x_ref = refs[0]                 # (1, M, E) f32 activations (TB bands)
        out_ref = refs[-1]              # (1, TB, C_PAD) f32
        wrefs = refs[1:-1]

        x = x_ref[0]                    # (M, E) f32

        # Per-band position index, hoisted out of the block loop.
        pos = lax.broadcasted_iota(jnp.int32, (tb, l_pad, C_PAD), 1)

        feats = []
        idx = 0
        for bi in range(block_num):
            depth = bi + 1
            h = x                                               # (M, C_in) f32
            for _ in range(depth):
                w = wrefs[idx][...]                             # (K*C_in, C_PAD) bf16
                b = wrefs[idx + 1][...]                         # (1, C_PAD) f32
                idx += 2
                # im2col via XLU rolls (fixed M, no shrinking / misaligned slices).
                cols = jnp.concatenate(
                    [h] + [pltpu.roll(h, m_rows - k, axis=0) for k in (1, 2)],
                    axis=-1)                                    # (M, K*C_in)
                y = jnp.dot(cols.astype(jnp.bfloat16), w,
                            preferred_element_type=jnp.float32)  # (M, C_PAD)
                h = jnp.maximum(y + b, 0.0)                     # bias + ReLU (f32)
            # AdaptiveMaxPool1d(1): per-band global max over the VALID rows only.
            valid_len = seq_len - 2 * depth
            h3 = h.reshape(tb, l_pad, C_PAD)
            h3 = jnp.where(pos < valid_len, h3, 0.0)            # post-ReLU => 0 mask ok
            feats.append(jnp.max(h3, axis=1))                   # (TB, C_PAD)

        cat = jnp.concatenate(feats, axis=-1).astype(jnp.bfloat16)  # (TB, bn*C_PAD)
        lw = wrefs[idx][...]                                    # (bn*C_PAD, C_PAD) bf16
        lb = wrefs[idx + 1][...]                                # (1, C_PAD) f32
        out_ref[0] = jnp.dot(cat, lw, preferred_element_type=jnp.float32) + lb

    return kernel


def init_params(key, block_num, vocab_size, embedding_num):
    """Deterministic synthetic parameters (same shapes as the PyTorch module)."""
    keys = jax.random.split(key, 4 + 2 * block_num * (block_num + 1))
    ki = iter(keys)
    emb = jax.random.normal(next(ki), (vocab_size, embedding_num), jnp.float32) * 0.1
    emb = emb.at[0].set(0.0)                                    # padding_idx=0
    blocks = []
    for bi in range(block_num):
        layers = []
        c_in = embedding_num
        for _ in range(bi + 1):
            # PyTorch Conv1d weight is (C_out, C_in, K); stored here as (K, C_in, C_out)
            w = jax.random.normal(next(ki), (KSIZE, c_in, C_OUT), jnp.float32) * 0.05
            b = jax.random.normal(next(ki), (C_OUT,), jnp.float32) * 0.05
            layers.append((w, b))
            c_in = C_OUT
        blocks.append(layers)
    # PyTorch Linear weight is (out, in); stored here transposed as (in, out)
    lw = jax.random.normal(next(ki), (block_num * C_OUT, C_OUT), jnp.float32) * 0.05
    lb = jax.random.normal(next(ki), (C_OUT,), jnp.float32) * 0.05
    return emb, blocks, (lw, lb)


def _choose_tb(batch, l_pad, target_rows=2048):
    """Sequences per grid step: fill M ~ target_rows but keep >= 2 grid steps."""
    tb = max(1, min(batch, max(1, target_rows // l_pad)))
    if batch > 1:
        tb = min(tb, (batch + 1) // 2)      # keep both TensorCores busy (v7x)
    return tb


def target_representation(tokens, emb, blocks, linear):
    B, L = tokens.shape
    block_num = len(blocks)
    vocab, emb_dim = emb.shape
    assert L >= 2 * block_num + 1, "sequence too short for the deepest conv stack"

    l_pad = ((L + 7) // 8) * 8
    tb = _choose_tb(B, l_pad)
    num_steps = (B + tb - 1) // tb
    b_pad = num_steps * tb

    # ---- embedding lookup in the wrapper (padding_idx=0 is a zeroed table row)
    x = jnp.take(emb.astype(jnp.float32), tokens.astype(jnp.int32), axis=0)   # (B,L,E)
    x = jnp.pad(x, ((0, b_pad - B), (0, l_pad - L), (0, 0)))
    x = x.reshape(num_steps, tb * l_pad, emb_dim)

    # ---- pack parameters (pad channels 96 -> 128, bf16 matmul weights, f32 bias)
    conv_arrays = []
    for layers in blocks:
        for li, (w, b) in enumerate(layers):
            _, c_in, c_out = w.shape
            w_p = jnp.pad(w, ((0, 0), (0, 0), (0, C_PAD - c_out)))
            if li > 0:  # hidden layers consume the 128-wide padded activation
                w_p = jnp.pad(w_p, ((0, 0), (0, C_PAD - c_in), (0, 0)))
            conv_arrays.append(
                w_p.reshape(KSIZE * w_p.shape[1], C_PAD).astype(jnp.bfloat16))
            conv_arrays.append(
                jnp.pad(b, (0, C_PAD - c_out)).reshape(1, C_PAD).astype(jnp.float32))

    lw, lb = linear
    lw_p = (jnp.pad(lw.reshape(block_num, C_OUT, C_OUT),
                    ((0, 0), (0, C_PAD - C_OUT), (0, C_PAD - C_OUT)))
            .reshape(block_num * C_PAD, C_PAD).astype(jnp.bfloat16))
    lb_p = jnp.pad(lb, (0, C_PAD - C_OUT)).reshape(1, C_PAD).astype(jnp.float32)

    inputs = [x] + conv_arrays + [lw_p, lb_p]

    # ---- block specs: step-tiled activations/output, whole-array resident weights
    def whole(a):
        return pl.BlockSpec(a.shape, lambda i, _nd=a.ndim: (0,) * _nd)

    in_specs = [pl.BlockSpec((1, tb * l_pad, emb_dim), lambda i: (i, 0, 0))]
    in_specs += [whole(a) for a in conv_arrays]
    in_specs += [whole(lw_p), whole(lb_p)]
    out_specs = pl.BlockSpec((1, tb, C_PAD), lambda i: (i, 0, 0))

    # ---- advisory cost estimate
    m = tb * l_pad
    flops = 0
    for bi in range(block_num):
        for li in range(bi + 1):
            kdim = KSIZE * (emb_dim if li == 0 else C_PAD)
            flops += 2 * m * kdim * C_PAD
    flops += 2 * tb * (block_num * C_PAD) * C_PAD
    flops *= num_steps
    bytes_accessed = (int(x.size) * 4
                      + sum(int(a.size) * a.dtype.itemsize for a in conv_arrays)
                      + int(lw_p.size) * 2 + int(lb_p.size) * 4
                      + b_pad * C_PAD * 4)
    cost = pl.CostEstimate(flops=int(flops), transcendentals=0,
                           bytes_accessed=int(bytes_accessed))

    out = pl.pallas_call(
        _make_kernel(block_num, L, l_pad, tb),
        out_shape=jax.ShapeDtypeStruct((num_steps, tb, C_PAD), jnp.float32),
        grid=(num_steps,),
        in_specs=in_specs,
        out_specs=out_specs,
        compiler_params=pltpu.CompilerParams(
            dimension_semantics=("parallel",)),
        cost_estimate=cost,
    )(*inputs)

    return out.reshape(b_pad, C_PAD)[:B, :C_OUT]                # (B, 96)


def reference_forward(tokens, emb, blocks, linear):
    """Pure-JAX f32 reference of the PyTorch forward (for correctness check)."""
    x = jnp.take(emb, tokens.astype(jnp.int32), axis=0)         # (B, L, E)
    feats = []
    for layers in blocks:
        h = x
        for (w, b) in layers:
            k, c_in, c_out = w.shape
            l_out = h.shape[1] - (k - 1)
            cols = jnp.concatenate([h[:, i:i + l_out, :] for i in range(k)], axis=-1)
            y = jnp.einsum('blk,kc->blc', cols, w.reshape(k * c_in, c_out)) + b
            h = jnp.maximum(y, 0.0)
        feats.append(jnp.max(h, axis=1))                        # AdaptiveMaxPool1d(1)
    cat = jnp.concatenate(feats, axis=-1)
    lw, lb = linear
    return cat @ lw + lb


if __name__ == "__main__":
    B, L = 2, 16
    block_num, vocab_size, embedding_num = 3, 26, 32

    key = jax.random.PRNGKey(0)
    pkey, tkey = jax.random.split(key)
    emb, blocks, linear = init_params(pkey, block_num, vocab_size, embedding_num)
    tokens = jax.random.randint(tkey, (B, L), 0, vocab_size, dtype=jnp.int32)

    out = target_representation(tokens, emb, blocks, linear)
    out = jax.block_until_ready(out)
    assert out.shape == (B, C_OUT), out.shape
    assert out.dtype == jnp.float32

    ref = jax.block_until_ready(reference_forward(tokens, emb, blocks, linear))
    err = float(jnp.max(jnp.abs(out - ref)))
    assert err < 3e-2, f"max abs error vs f32 reference too large: {err}"
    print("KERNEL_OK")
</pallas_src>

<mosaic_0001>
module attributes {stable_mosaic.version = 11 : i64} {
  func.func @kernel(%arg0: i32, %arg1: memref<1x16x32xf32, #tpu.memory_space<vmem>>, %arg2: memref<96x128xbf16, #tpu.memory_space<vmem>>, %arg3: memref<1x128xf32, #tpu.memory_space<vmem>>, %arg4: memref<96x128xbf16, #tpu.memory_space<vmem>>, %arg5: memref<1x128xf32, #tpu.memory_space<vmem>>, %arg6: memref<384x128xbf16, #tpu.memory_space<vmem>>, %arg7: memref<1x128xf32, #tpu.memory_space<vmem>>, %arg8: memref<96x128xbf16, #tpu.memory_space<vmem>>, %arg9: memref<1x128xf32, #tpu.memory_space<vmem>>, %arg10: memref<384x128xbf16, #tpu.memory_space<vmem>>, %arg11: memref<1x128xf32, #tpu.memory_space<vmem>>, %arg12: memref<384x128xbf16, #tpu.memory_space<vmem>>, %arg13: memref<1x128xf32, #tpu.memory_space<vmem>>, %arg14: memref<384x128xbf16, #tpu.memory_space<vmem>>, %arg15: memref<1x128xf32, #tpu.memory_space<vmem>>, %arg16: memref<1x1x128xf32, #tpu.memory_space<vmem>>) attributes {dimension_semantics = [#tpu.dimension_semantics<parallel>], iteration_bounds = array<i64: 2>, scalar_prefetch = 0 : i64, scratch_operands = 0 : i64, tpu.core_type = #tpu.core_type<tc>, window_params = [{transform_indices = @transform_0, window_bounds = array<i64: 1, 16, 32>}, {pipeline_mode = #tpu.pipeline_mode<synchronous>, transform_indices = @transform_1, window_bounds = array<i64: 96, 128>}, {pipeline_mode = #tpu.pipeline_mode<synchronous>, transform_indices = @transform_2, window_bounds = array<i64: 1, 128>}, {pipeline_mode = #tpu.pipeline_mode<synchronous>, transform_indices = @transform_3, window_bounds = array<i64: 96, 128>}, {pipeline_mode = #tpu.pipeline_mode<synchronous>, transform_indices = @transform_4, window_bounds = array<i64: 1, 128>}, {pipeline_mode = #tpu.pipeline_mode<synchronous>, transform_indices = @transform_5, window_bounds = array<i64: 384, 128>}, {pipeline_mode = #tpu.pipeline_mode<synchronous>, transform_indices = @transform_6, window_bounds = array<i64: 1, 128>}, {pipeline_mode = #tpu.pipeline_mode<synchronous>, transform_indices = @transform_7, window_bounds = array<i64: 96, 128>}, {pipeline_mode = #tpu.pipeline_mode<synchronous>, transform_indices = @transform_8, window_bounds = array<i64: 1, 128>}, {pipeline_mode = #tpu.pipeline_mode<synchronous>, transform_indices = @transform_9, window_bounds = array<i64: 384, 128>}, {pipeline_mode = #tpu.pipeline_mode<synchronous>, transform_indices = @transform_10, window_bounds = array<i64: 1, 128>}, {pipeline_mode = #tpu.pipeline_mode<synchronous>, transform_indices = @transform_11, window_bounds = array<i64: 384, 128>}, {pipeline_mode = #tpu.pipeline_mode<synchronous>, transform_indices = @transform_12, window_bounds = array<i64: 1, 128>}, {pipeline_mode = #tpu.pipeline_mode<synchronous>, transform_indices = @transform_13, window_bounds = array<i64: 384, 128>}, {pipeline_mode = #tpu.pipeline_mode<synchronous>, transform_indices = @transform_14, window_bounds = array<i64: 1, 128>}, {transform_indices = @transform_15, window_bounds = array<i64: 1, 1, 128>}]} {
    %c0 = arith.constant 0 : index
    %c0_0 = arith.constant 0 : index
    %c0_1 = arith.constant 0 : index
    %0 = vector.load %arg1[%c0, %c0_0, %c0_1] : memref<1x16x32xf32, #tpu.memory_space<vmem>>, vector<1x16x32xf32>
    %1 = vector.shape_cast %0 : vector<1x16x32xf32> to vector<16x32xf32>
    %2 = tpu.iota {dimensions = array<i32: 1>} : vector<1x16x128xi32>
    %c0_2 = arith.constant 0 : index
    %c0_3 = arith.constant 0 : index
    %3 = vector.load %arg2[%c0_2, %c0_3] : memref<96x128xbf16, #tpu.memory_space<vmem>>, vector<96x128xbf16>
    %c0_4 = arith.constant 0 : index
    %c0_5 = arith.constant 0 : index
    %4 = vector.load %arg3[%c0_4, %c0_5] : memref<1x128xf32, #tpu.memory_space<vmem>>, vector<1x128xf32>
    %c15_i32 = arith.constant 15 : i32
    %5 = tpu.dynamic_rotate %1 by %c15_i32 dim 0 : vector<16x32xf32>, i32 -> vector<16x32xf32>
    %c14_i32 = arith.constant 14 : i32
    %6 = tpu.dynamic_rotate %1 by %c14_i32 dim 0 : vector<16x32xf32>, i32 -> vector<16x32xf32>
    %7 = tpu.concatenate %1, %5, %6 in 1 : vector<16x32xf32>, vector<16x32xf32>, vector<16x32xf32> -> vector<16x96xf32>
    %8 = arith.truncf %7 : vector<16x96xf32> to vector<16x96xbf16>
    %cst = arith.constant dense<0.000000e+00> : vector<16x128xf32>
    %9 = tpu.matmul %8, %3, %cst {dimension_numbers = #tpu.dot_dimension_numbers<[1], [0], [0], [1], [0, 0, 1, 1], [], []>} : vector<16x96xbf16>, vector<96x128xbf16>, vector<16x128xf32> -> vector<16x128xf32>
    %10 = vector.broadcast %4 : vector<1x128xf32> to vector<16x128xf32>
    %11 = arith.addf %9, %10 : vector<16x128xf32>
    %cst_6 = arith.constant 0.000000e+00 : f32
    %12 = vector.broadcast %cst_6 : f32 to vector<16x128xf32>
    %13 = arith.maximumf %11, %12 : vector<16x128xf32>
    %14 = vector.shape_cast %13 : vector<16x128xf32> to vector<1x16x128xf32>
    %c14_i32_7 = arith.constant 14 : i32
    %15 = vector.broadcast %c14_i32_7 : i32 to vector<1x16x128xi32>
    %16 = arith.cmpi slt, %2, %15 : vector<1x16x128xi32>
    %cst_8 = arith.constant 0.000000e+00 : f32
    %17 = vector.broadcast %cst_8 : f32 to vector<1x16x128xf32>
    %18 = arith.select %16, %14, %17 : vector<1x16x128xi1>, vector<1x16x128xf32>
    %cst_9 = arith.constant dense<0xFF800000> : vector<1x128xf32>
    %19 = vector.multi_reduction <maximumf>, %18, %cst_9 [1] : vector<1x16x128xf32> to vector<1x128xf32>
    %c0_10 = arith.constant 0 : index
    %c0_11 = arith.constant 0 : index
    %20 = vector.load %arg4[%c0_10, %c0_11] : memref<96x128xbf16, #tpu.memory_space<vmem>>, vector<96x128xbf16>
    %c0_12 = arith.constant 0 : index
    %c0_13 = arith.constant 0 : index
    %21 = vector.load %arg5[%c0_12, %c0_13] : memref<1x128xf32, #tpu.memory_space<vmem>>, vector<1x128xf32>
    %c15_i32_14 = arith.constant 15 : i32
    %22 = tpu.dynamic_rotate %1 by %c15_i32_14 dim 0 : vector<16x32xf32>, i32 -> vector<16x32xf32>
    %c14_i32_15 = arith.constant 14 : i32
    %23 = tpu.dynamic_rotate %1 by %c14_i32_15 dim 0 : vector<16x32xf32>, i32 -> vector<16x32xf32>
    %24 = tpu.concatenate %1, %22, %23 in 1 : vector<16x32xf32>, vector<16x32xf32>, vector<16x32xf32> -> vector<16x96xf32>
    %25 = arith.truncf %24 : vector<16x96xf32> to vector<16x96xbf16>
    %cst_16 = arith.constant dense<0.000000e+00> : vector<16x128xf32>
    %26 = tpu.matmul %25, %20, %cst_16 {dimension_numbers = #tpu.dot_dimension_numbers<[1], [0], [0], [1], [0, 0, 1, 1], [], []>} : vector<16x96xbf16>, vector<96x128xbf16>, vector<16x128xf32> -> vector<16x128xf32>
    %27 = vector.broadcast %21 : vector<1x128xf32> to vector<16x128xf32>
    %28 = arith.addf %26, %27 : vector<16x128xf32>
    %cst_17 = arith.constant 0.000000e+00 : f32
    %29 = vector.broadcast %cst_17 : f32 to vector<16x128xf32>
    %30 = arith.maximumf %28, %29 : vector<16x128xf32>
    %c0_18 = arith.constant 0 : index
    %c0_19 = arith.constant 0 : index
    %31 = vector.load %arg6[%c0_18, %c0_19] : memref<384x128xbf16, #tpu.memory_space<vmem>>, vector<384x128xbf16>
    %c0_20 = arith.constant 0 : index
    %c0_21 = arith.constant 0 : index
    %32 = vector.load %arg7[%c0_20, %c0_21] : memref<1x128xf32, #tpu.memory_space<vmem>>, vector<1x128xf32>
    %c15_i32_22 = arith.constant 15 : i32
    %33 = tpu.dynamic_rotate %30 by %c15_i32_22 dim 0 : vector<16x128xf32>, i32 -> vector<16x128xf32>
    %c14_i32_23 = arith.constant 14 : i32
    %34 = tpu.dynamic_rotate %30 by %c14_i32_23 dim 0 : vector<16x128xf32>, i32 -> vector<16x128xf32>
    %35 = tpu.concatenate %30, %33, %34 in 1 : vector<16x128xf32>, vector<16x128xf32>, vector<16x128xf32> -> vector<16x384xf32>
    %36 = arith.truncf %35 : vector<16x384xf32> to vector<16x384xbf16>
    %cst_24 = arith.constant dense<0.000000e+00> : vector<16x128xf32>
    %37 = tpu.matmul %36, %31, %cst_24 {dimension_numbers = #tpu.dot_dimension_numbers<[1], [0], [0], [1], [0, 0, 1, 1], [], []>} : vector<16x384xbf16>, vector<384x128xbf16>, vector<16x128xf32> -> vector<16x128xf32>
    %38 = vector.broadcast %32 : vector<1x128xf32> to vector<16x128xf32>
    %39 = arith.addf %37, %38 : vector<16x128xf32>
    %cst_25 = arith.constant 0.000000e+00 : f32
    %40 = vector.broadcast %cst_25 : f32 to vector<16x128xf32>
    %41 = arith.maximumf %39, %40 : vector<16x128xf32>
    %42 = vector.shape_cast %41 : vector<16x128xf32> to vector<1x16x128xf32>
    %c12_i32 = arith.constant 12 : i32
    %43 = vector.broadcast %c12_i32 : i32 to vector<1x16x128xi32>
    %44 = arith.cmpi slt, %2, %43 : vector<1x16x128xi32>
    %cst_26 = arith.constant 0.000000e+00 : f32
    %45 = vector.broadcast %cst_26 : f32 to vector<1x16x128xf32>
    %46 = arith.select %44, %42, %45 : vector<1x16x128xi1>, vector<1x16x128xf32>
    %cst_27 = arith.constant dense<0xFF800000> : vector<1x128xf32>
    %47 = vector.multi_reduction <maximumf>, %46, %cst_27 [1] : vector<1x16x128xf32> to vector<1x128xf32>
    %c0_28 = arith.constant 0 : index
    %c0_29 = arith.constant 0 : index
    %48 = vector.load %arg8[%c0_28, %c0_29] : memref<96x128xbf16, #tpu.memory_space<vmem>>, vector<96x128xbf16>
    %c0_30 = arith.constant 0 : index
    %c0_31 = arith.constant 0 : index
    %49 = vector.load %arg9[%c0_30, %c0_31] : memref<1x128xf32, #tpu.memory_space<vmem>>, vector<1x128xf32>
    %c15_i32_32 = arith.constant 15 : i32
    %50 = tpu.dynamic_rotate %1 by %c15_i32_32 dim 0 : vector<16x32xf32>, i32 -> vector<16x32xf32>
    %c14_i32_33 = arith.constant 14 : i32
    %51 = tpu.dynamic_rotate %1 by %c14_i32_33 dim 0 : vector<16x32xf32>, i32 -> vector<16x32xf32>
    %52 = tpu.concatenate %1, %50, %51 in 1 : vector<16x32xf32>, vector<16x32xf32>, vector<16x32xf32> -> vector<16x96xf32>
    %53 = arith.truncf %52 : vector<16x96xf32> to vector<16x96xbf16>
    %cst_34 = arith.constant dense<0.000000e+00> : vector<16x128xf32>
    %54 = tpu.matmul %53, %48, %cst_34 {dimension_numbers = #tpu.dot_dimension_numbers<[1], [0], [0], [1], [0, 0, 1, 1], [], []>} : vector<16x96xbf16>, vector<96x128xbf16>, vector<16x128xf32> -> vector<16x128xf32>
    %55 = vector.broadcast %49 : vector<1x128xf32> to vector<16x128xf32>
    %56 = arith.addf %54, %55 : vector<16x128xf32>
    %cst_35 = arith.constant 0.000000e+00 : f32
    %57 = vector.broadcast %cst_35 : f32 to vector<16x128xf32>
    %58 = arith.maximumf %56, %57 : vector<16x128xf32>
    %c0_36 = arith.constant 0 : index
    %c0_37 = arith.constant 0 : index
    %59 = vector.load %arg10[%c0_36, %c0_37] : memref<384x128xbf16, #tpu.memory_space<vmem>>, vector<384x128xbf16>
    %c0_38 = arith.constant 0 : index
    %c0_39 = arith.constant 0 : index
    %60 = vector.load %arg11[%c0_38, %c0_39] : memref<1x128xf32, #tpu.memory_space<vmem>>, vector<1x128xf32>
    %c15_i32_40 = arith.constant 15 : i32
    %61 = tpu.dynamic_rotate %58 by %c15_i32_40 dim 0 : vector<16x128xf32>, i32 -> vector<16x128xf32>
    %c14_i32_41 = arith.constant 14 : i32
    %62 = tpu.dynamic_rotate %58 by %c14_i32_41 dim 0 : vector<16x128xf32>, i32 -> vector<16x128xf32>
    %63 = tpu.concatenate %58, %61, %62 in 1 : vector<16x128xf32>, vector<16x128xf32>, vector<16x128xf32> -> vector<16x384xf32>
    %64 = arith.truncf %63 : vector<16x384xf32> to vector<16x384xbf16>
    %cst_42 = arith.constant dense<0.000000e+00> : vector<16x128xf32>
    %65 = tpu.matmul %64, %59, %cst_42 {dimension_numbers = #tpu.dot_dimension_numbers<[1], [0], [0], [1], [0, 0, 1, 1], [], []>} : vector<16x384xbf16>, vector<384x128xbf16>, vector<16x128xf32> -> vector<16x128xf32>
    %66 = vector.broadcast %60 : vector<1x128xf32> to vector<16x128xf32>
    %67 = arith.addf %65, %66 : vector<16x128xf32>
    %cst_43 = arith.constant 0.000000e+00 : f32
    %68 = vector.broadcast %cst_43 : f32 to vector<16x128xf32>
    %69 = arith.maximumf %67, %68 : vector<16x128xf32>
    %c0_44 = arith.constant 0 : index
    %c0_45 = arith.constant 0 : index
    %70 = vector.load %arg12[%c0_44, %c0_45] : memref<384x128xbf16, #tpu.memory_space<vmem>>, vector<384x128xbf16>
    %c0_46 = arith.constant 0 : index
    %c0_47 = arith.constant 0 : index
    %71 = vector.load %arg13[%c0_46, %c0_47] : memref<1x128xf32, #tpu.memory_space<vmem>>, vector<1x128xf32>
    %c15_i32_48 = arith.constant 15 : i32
    %72 = tpu.dynamic_rotate %69 by %c15_i32_48 dim 0 : vector<16x128xf32>, i32 -> vector<16x128xf32>
    %c14_i32_49 = arith.constant 14 : i32
    %73 = tpu.dynamic_rotate %69 by %c14_i32_49 dim 0 : vector<16x128xf32>, i32 -> vector<16x128xf32>
    %74 = tpu.concatenate %69, %72, %73 in 1 : vector<16x128xf32>, vector<16x128xf32>, vector<16x128xf32> -> vector<16x384xf32>
    %75 = arith.truncf %74 : vector<16x384xf32> to vector<16x384xbf16>
    %cst_50 = arith.constant dense<0.000000e+00> : vector<16x128xf32>
    %76 = tpu.matmul %75, %70, %cst_50 {dimension_numbers = #tpu.dot_dimension_numbers<[1], [0], [0], [1], [0, 0, 1, 1], [], []>} : vector<16x384xbf16>, vector<384x128xbf16>, vector<16x128xf32> -> vector<16x128xf32>
    %77 = vector.broadcast %71 : vector<1x128xf32> to vector<16x128xf32>
    %78 = arith.addf %76, %77 : vector<16x128xf32>
    %cst_51 = arith.constant 0.000000e+00 : f32
    %79 = vector.broadcast %cst_51 : f32 to vector<16x128xf32>
    %80 = arith.maximumf %78, %79 : vector<16x128xf32>
    %81 = vector.shape_cast %80 : vector<16x128xf32> to vector<1x16x128xf32>
    %c10_i32 = arith.constant 10 : i32
    %82 = vector.broadcast %c10_i32 : i32 to vector<1x16x128xi32>
    %83 = arith.cmpi slt, %2, %82 : vector<1x16x128xi32>
    %cst_52 = arith.constant 0.000000e+00 : f32
    %84 = vector.broadcast %cst_52 : f32 to vector<1x16x128xf32>
    %85 = arith.select %83, %81, %84 : vector<1x16x128xi1>, vector<1x16x128xf32>
    %cst_53 = arith.constant dense<0xFF800000> : vector<1x128xf32>
    %86 = vector.multi_reduction <maximumf>, %85, %cst_53 [1] : vector<1x16x128xf32> to vector<1x128xf32>
    %87 = tpu.concatenate %19, %47, %86 in 1 : vector<1x128xf32>, vector<1x128xf32>, vector<1x128xf32> -> vector<1x384xf32>
    %88 = arith.truncf %87 : vector<1x384xf32> to vector<1x384xbf16>
    %c0_54 = arith.constant 0 : index
    %c0_55 = arith.constant 0 : index
    %89 = vector.load %arg14[%c0_54, %c0_55] : memref<384x128xbf16, #tpu.memory_space<vmem>>, vector<384x128xbf16>
    %c0_56 = arith.constant 0 : index
    %c0_57 = arith.constant 0 : index
    %90 = vector.load %arg15[%c0_56, %c0_57] : memref<1x128xf32, #tpu.memory_space<vmem>>, vector<1x128xf32>
    %cst_58 = arith.constant dense<0.000000e+00> : vector<1x128xf32>
    %91 = tpu.matmul %88, %89, %cst_58 {dimension_numbers = #tpu.dot_dimension_numbers<[1], [0], [0], [1], [0, 0, 1, 1], [], []>} : vector<1x384xbf16>, vector<384x128xbf16>, vector<1x128xf32> -> vector<1x128xf32>
    %92 = arith.addf %91, %90 : vector<1x128xf32>
    %c0_59 = arith.constant 0 : index
    %c0_60 = arith.constant 0 : index
    %c0_61 = arith.constant 0 : index
    %93 = vector.load %arg16[%c0_59, %c0_60, %c0_61] : memref<1x1x128xf32, #tpu.memory_space<vmem>>, vector<1x1x128xf32>
    %94 = vector.shape_cast %93 : vector<1x1x128xf32> to vector<1x128xf32>
    %95 = vector.shape_cast %92 : vector<1x128xf32> to vector<1x1x128xf32>
    tpu.vector_store %arg16[%c0_59, %c0_60, %c0_61], %95 {strides = array<i32>} : memref<1x1x128xf32, #tpu.memory_space<vmem>>, vector<1x1x128xf32>,
    return
  }
  func.func @transform_0(%arg0: i32) -> (i32, i32, i32) {
    %c0_i32 = arith.constant 0 : i32
    %c0_i32_0 = arith.constant 0 : i32
    %c0_i32_1 = arith.constant 0 : i32
    return %arg0, %c0_i32, %c0_i32_0 : i32, i32, i32
  }
  func.func @transform_1(%arg0: i32) -> (i32, i32) {
    %c0_i32 = arith.constant 0 : i32
    %c0_i32_0 = arith.constant 0 : i32
    %c0_i32_1 = arith.constant 0 : i32
    return %c0_i32, %c0_i32_0 : i32, i32
  }
  func.func @transform_2(%arg0: i32) -> (i32, i32) {
    %c0_i32 = arith.constant 0 : i32
    %c0_i32_0 = arith.constant 0 : i32
    %c0_i32_1 = arith.constant 0 : i32
    return %c0_i32, %c0_i32_0 : i32, i32
  }
  func.func @transform_3(%arg0: i32) -> (i32, i32) {
    %c0_i32 = arith.constant 0 : i32
    %c0_i32_0 = arith.constant 0 : i32
    %c0_i32_1 = arith.constant 0 : i32
    return %c0_i32, %c0_i32_0 : i32, i32
  }
  func.func @transform_4(%arg0: i32) -> (i32, i32) {
    %c0_i32 = arith.constant 0 : i32
    %c0_i32_0 = arith.constant 0 : i32
    %c0_i32_1 = arith.constant 0 : i32
    return %c0_i32, %c0_i32_0 : i32, i32
  }
  func.func @transform_5(%arg0: i32) -> (i32, i32) {
    %c0_i32 = arith.constant 0 : i32
    %c0_i32_0 = arith.constant 0 : i32
    %c0_i32_1 = arith.constant 0 : i32
    return %c0_i32, %c0_i32_0 : i32, i32
  }
  func.func @transform_6(%arg0: i32) -> (i32, i32) {
    %c0_i32 = arith.constant 0 : i32
    %c0_i32_0 = arith.constant 0 : i32
    %c0_i32_1 = arith.constant 0 : i32
    return %c0_i32, %c0_i32_0 : i32, i32
  }
  func.func @transform_7(%arg0: i32) -> (i32, i32) {
    %c0_i32 = arith.constant 0 : i32
    %c0_i32_0 = arith.constant 0 : i32
    %c0_i32_1 = arith.constant 0 : i32
    return %c0_i32, %c0_i32_0 : i32, i32
  }
  func.func @transform_8(%arg0: i32) -> (i32, i32) {
    %c0_i32 = arith.constant 0 : i32
    %c0_i32_0 = arith.constant 0 : i32
    %c0_i32_1 = arith.constant 0 : i32
    return %c0_i32, %c0_i32_0 : i32, i32
  }
  func.func @transform_9(%arg0: i32) -> (i32, i32) {
    %c0_i32 = arith.constant 0 : i32
    %c0_i32_0 = arith.constant 0 : i32
    %c0_i32_1 = arith.constant 0 : i32
    return %c0_i32, %c0_i32_0 : i32, i32
  }
  func.func @transform_10(%arg0: i32) -> (i32, i32) {
    %c0_i32 = arith.constant 0 : i32
    %c0_i32_0 = arith.constant 0 : i32
    %c0_i32_1 = arith.constant 0 : i32
    return %c0_i32, %c0_i32_0 : i32, i32
  }
  func.func @transform_11(%arg0: i32) -> (i32, i32) {
    %c0_i32 = arith.constant 0 : i32
    %c0_i32_0 = arith.constant 0 : i32
    %c0_i32_1 = arith.constant 0 : i32
    return %c0_i32, %c0_i32_0 : i32, i32
  }
  func.func @transform_12(%arg0: i32) -> (i32, i32) {
    %c0_i32 = arith.constant 0 : i32
    %c0_i32_0 = arith.constant 0 : i32
    %c0_i32_1 = arith.constant 0 : i32
    return %c0_i32, %c0_i32_0 : i32, i32
  }
  func.func @transform_13(%arg0: i32) -> (i32, i32) {
    %c0_i32 = arith.constant 0 : i32
    %c0_i32_0 = arith.constant 0 : i32
    %c0_i32_1 = arith.constant 0 : i32
    return %c0_i32, %c0_i32_0 : i32, i32
  }
  func.func @transform_14(%arg0: i32) -> (i32, i32) {
    %c0_i32 = arith.constant 0 : i32
    %c0_i32_0 = arith.constant 0 : i32
    %c0_i32_1 = arith.constant 0 : i32
    return %c0_i32, %c0_i32_0 : i32, i32
  }
  func.func @transform_15(%arg0: i32) -> (i32, i32, i32) {
    %c0_i32 = arith.constant 0 : i32
    %c0_i32_0 = arith.constant 0 : i32
    %c0_i32_1 = arith.constant 0 : i32
    return %arg0, %c0_i32, %c0_i32_0 : i32, i32, i32
  }
}

</mosaic_0001>

<bundles_post_ra>
// kernel: tpu_custom_call.1
= control target key start
LH: loop header
LB: loop body
LE: loop exit
PB: predicated region body
PF: predicated region fallthrough
CT: control target
= control target key end

     0   :  { %s3881_s0 = inlined_call_operand.hbm [shape: f32[2,16,32], index: 0, kind: input, shape index: {}]   ;;  %s3882_s1 = inlined_call_operand.hbm [shape: bf16[96,128], index: 1, kind: input, shape index: {}]   ;;  %s3883_s2 = inlined_call_operand.vmem [shape: f32[1,128], index: 2, kind: input, shape index: {}]   ;;  %s3884_s3 = inlined_call_operand.hbm [shape: bf16[96,128], index: 3, kind: input, shape index: {}]   ;;  %s3885_s4 = inlined_call_operand.vmem [shape: f32[1,128], index: 4, kind: input, shape index: {}]   ;;  %s3886_s5 = inlined_call_operand.hbm [shape: bf16[384,128], index: 5, kind: input, shape index: {}]   ;;  %s3887_s6 = inlined_call_operand.vmem [shape: f32[1,128], index: 6, kind: input, shape index: {}]   ;;  %s3888_s7 = inlined_call_operand.hbm [shape: bf16[96,128], index: 7, kind: input, shape index: {}]   ;;  %s3889_s8 = inlined_call_operand.vmem [shape: f32[1,128], index: 8, kind: input, shape index: {}]   ;;  %s3890_s9 = inlined_call_operand.hbm [shape: bf16[384,128], index: 9, kind: input, shape index: {}]   ;;  %s3891_s10 = inlined_call_operand.vmem [shape: f32[1,128], index: 10, kind: input, shape index: {}]   ;;  %s3892_s11 = inlined_call_operand.hbm [shape: bf16[384,128], index: 11, kind: input, shape index: {}]   ;;  %s3893_s12 = inlined_call_operand.vmem [shape: f32[1,128], index: 12, kind: input, shape index: {}]   ;;  %s3894_s13 = inlined_call_operand.hbm [shape: bf16[384,128], index: 13, kind: input, shape index: {}]   ;;  %s3895_s14 = inlined_call_operand.vmem [shape: f32[1,128], index: 14, kind: input, shape index: {}]   ;;  %s3896_s15 = inlined_call_operand.hbm [shape: f32[2,1,128], index: 15, kind: output, shape index: {}]  }
   0x1   :  { %3901 = sst [smem:[#allocation23_spill]] %s3882_s1 }
   0x2   :  { %3902 = sst [smem:[#allocation24_spill]] %s3883_s2 }
   0x3   :  { %3903 = sst [smem:[#allocation25_spill]] %s3887_s6 }
   0x4   :  { %3904 = sst [smem:[#allocation26_spill]] %s3889_s8 }
   0x5   :  { %3905 = sst [smem:[#allocation27_spill]] %s3891_s10 }
   0x6   :  { %3906 = sst [smem:[#allocation28_spill]] %s3893_s12 }
   0x7   :  { %3907 = sst [smem:[#allocation29_spill]] %s3895_s14 }
   0x8   :  { %3908 = sst [smem:[#allocation30_spill]] %s3896_s15 }
   0x9   :  { %20 = vsyncpa [#allocation3], 0 }
   0xa   :  { %22 = vsyncpa [#allocation3 + $0x1], 0 }
   0xb   :  { %23 = vsyncpa [#allocation6], 0 }
   0xc   :  { %24 = vsyncpa [#allocation9], 0 }
   0xd   :  { %25 = vsyncpa [#allocation12], 0 }
   0xe   :  { %26 = vsyncpa [#allocation15], 0 }
   0xf   :  { %27 = vsyncpa [#allocation4], 0 }
  0x10   :  { %29 = vsyncpa [#allocation4 + $0x1], 0  ;;  %s3367_s18 = smov 0   ;;  %s3369_s19 = smov 0  }
  0x11   :  { %s3371_s20 = smov 0   ;;  %s3373_s21 = smov 0  }
  0x12 LB: > { %s3270_s22 = smov [#allocation5]   ;;  %s3388_s24 = sadd.s32 4294967295, %s3268_s21   ;;  %s3268_s21 = sphi %s3373_s21, %s3940_s21   ;;  %s3264_s20 = sphi %s3371_s20, %s3939_s20   ;;  %s3260_s19 = sphi %s3369_s19, %s3938_s19   ;;  %s3256_s18 = sphi %s3367_s18, %s3937_s18  }
  0x13   : > { %s398_s23 = sshll.u32 %s3270_s22, 4  ;;  %p2290_p0 = scmp.ge.s32.totalorder %s3268_s21, 1  ;;  %s3393_s23 = int_to_ptr.vmem [resolvable:$true] %s398_s23 }
  0x14   : > { %p3898_p1 = scmp.eq.s32.totalorder %s3388_s24, 0  ;;  %p386_p2 = scmp.lt.s32.totalorder %s3268_s21, 3 }
  0x15   : > { %s3271_s26 = smov [#allocation8]   ;;  %s3272_s29 = smov [#allocation11]  }
  0x16   : > { %p3395_p3 = pnand %p2290_p0, %p386_p2  ;;  %s430_s27 = sshll.u32 %s3271_s26, 4  ;;  %s3408_s27 = int_to_ptr.vmem [resolvable:$true] %s430_s27 }
  0x17   : > { %s462_s30 = sshll.u32 %s3272_s29, 4  ;;  %s3911_s1 = sld [smem:[#allocation23_spill]]  ;;  %s3410_s30 = int_to_ptr.vmem [resolvable:$true] %s462_s30 }
  0x18   : > { %s3909_s25 = scalar_select %p3395_p3, 1, 0 }
  0x19   : > { %p2743_p5 = pneg %p3395_p3 }
  0x1b   : > { %p3404_p6 = pnand %p2743_p5, %p3898_p1 }
  0x1d   : > { %s2960_s22 = scalar_lea.hbm %s3911_s1, 768  ;;  %p3420_p8 = pneg %p3404_p6 }
  0x1e   : > { %p2961_p7 = scmp.ne.s32.totalorder %s3911_s1, %s2960_s22  ;;  %p2967_p11 = scmp.lt.u32.totalorder %s2960_s22, %s3911_s1 }
  0x20   : > { %p2963_p9 = pnand %p3420_p8, %p2961_p7 }
  0x22   : > { %p2964_p10 = pneg %p2963_p9 }
  0x24   : > { %p2969_p12 = pnand %p2967_p11, %p2964_p10 }
  0x26   : > { %2972 = shalt.err (!%p2969_p12)
}
  0x27   : > { %s2973_s14 = scalar_lea.vmem %s3393_s23, 768  ;;  %p2981_p5 = scmp.lt.s32.totalorder %s3393_s23, %s3393_s23 }
  0x28   : > { %p2974_p13 = scmp.ne.s32.totalorder %s3393_s23, %s2973_s14  ;;  %p2982_p4 = scmp.lt.s32.totalorder %s2973_s14, %s2973_s14 }
  0x2a   : > { %p2976_p0 = pnand %p2974_p13, %p3420_p8  ;;  %p2983_p7 = por %p2982_p4, %p2981_p5 }
  0x2c   : > { %p2977_p2 = pneg %p2976_p0 }
  0x2e   : > { %p2984_p9 = pnand %p2983_p7, %p2977_p2 }
  0x30   : > { %2987 = shalt.err (!%p2984_p9)
}
  0x31   : > { %s3273_s15 = smov 64   ;;  %s3274_s12 = smov 4  }
  0x32   : > { %2746 = dma.hbm_to_vmem [thread:$0]  (!%p3404_p6), %s3911_s1, 768, %s3393_s23, [#allocation6], %s3273_s15, %s3273_s15, %s3274_s12  }
  0x33   : > { %s2988_s14 = scalar_lea.hbm %s3886_s5, 3072 }
  0x34   : > { %p2989_p4 = scmp.ne.s32.totalorder %s3886_s5, %s2988_s14  ;;  %p2995_p12 = scmp.lt.u32.totalorder %s2988_s14, %s3886_s5 }
  0x36   : > { %p2991_p10 = pnand %p2989_p4, %p3420_p8 }
  0x38   : > { %p2992_p11 = pneg %p2991_p10 }
  0x3a   : > { %p2997_p13 = pnand %p2995_p12, %p2992_p11 }
  0x3c   : > { %3000 = shalt.err (!%p2997_p13)
}
  0x3d   : > { %s3001_s23 = scalar_lea.vmem %s3408_s27, 3072  ;;  %p3009_p7 = scmp.lt.s32.totalorder %s3408_s27, %s3408_s27 }
  0x3e   : > { %p3002_p0 = scmp.ne.s32.totalorder %s3408_s27, %s3001_s23  ;;  %p3010_p9 = scmp.lt.s32.totalorder %s3001_s23, %s3001_s23 }
  0x40   : > { %p3004_p2 = pnand %p3002_p0, %p3420_p8  ;;  %p3011_p4 = por %p3010_p9, %p3009_p7 }
  0x42   : > { %p3005_p5 = pneg %p3004_p2 }
  0x44   : > { %p3012_p10 = pnand %p3011_p4, %p3005_p5 }
  0x46   : > { %3015 = shalt.err (!%p3012_p10)
}
  0x47   : > { %2752 = dma.hbm_to_vmem [thread:$0]  (!%p3404_p6), %s3886_s5, 3072, %s3408_s27, [#allocation9], %s3273_s15, %s3273_s15, %s3274_s12  }
  0x48   : > { %s3016_s16 = scalar_lea.hbm %s3890_s9, 3072 }
  0x49   : > { %p3017_p11 = scmp.ne.s32.totalorder %s3890_s9, %s3016_s16  ;;  %p3023_p0 = scmp.lt.u32.totalorder %s3016_s16, %s3890_s9 }
  0x4b   : > { %p3019_p12 = pnand %p3017_p11, %p3420_p8 }
  0x4d   : > { %p3020_p13 = pneg %p3019_p12 }
  0x4f   : > { %p3025_p2 = pnand %p3023_p0, %p3020_p13 }
  0x51   : > { %3028 = shalt.err (!%p3025_p2)
}
  0x52   : > { %s3029_s27 = scalar_lea.vmem %s3410_s30, 3072  ;;  %p3037_p4 = scmp.lt.s32.totalorder %s3410_s30, %s3410_s30 }
  0x53   : > { %p3030_p5 = scmp.ne.s32.totalorder %s3410_s30, %s3029_s27  ;;  %p3038_p10 = scmp.lt.s32.totalorder %s3029_s27, %s3029_s27 }
  0x55   : > { %p3032_p7 = pnand %p3030_p5, %p3420_p8  ;;  %p3039_p11 = por %p3038_p10, %p3037_p4 }
  0x57   : > { %p3033_p9 = pneg %p3032_p7 }
  0x59   : > { %p3040_p12 = pnand %p3039_p11, %p3033_p9 }
  0x5b   : > { %3043 = shalt.err (!%p3040_p12)
}
  0x5c   : > { %2758 = dma.hbm_to_vmem [thread:$0]  (!%p3404_p6), %s3890_s9, 3072, %s3410_s30, [#allocation12], %s3273_s15, %s3273_s15, %s3274_s12  }
  0x5d   : > { %s3275_s6 = smov [#allocation7]   ;;  %s3276_s10 = smov [#allocation10]  }
  0x5e   : > { %s414_s8 = sshll.u32 %s3275_s6, 4  ;;  %s446_s16 = sshll.u32 %s3276_s10, 4  ;;  %s415_s8 = int_to_ptr.vmem [resolvable:$true] %s414_s8  ;;  %s447_s16 = int_to_ptr.vmem [resolvable:$true] %s446_s16 }
  0x5f   : > { %s3044_s29 = scalar_lea.hbm %s3884_s3, 768 }
  0x60   : > { %p3045_p13 = scmp.ne.s32.totalorder %s3884_s3, %s3044_s29  ;;  %p3051_p5 = scmp.lt.u32.totalorder %s3044_s29, %s3884_s3 }
  0x62   : > { %p3047_p0 = pnand %p3045_p13, %p3420_p8 }
  0x64   : > { %p3048_p2 = pneg %p3047_p0 }
  0x66   : > { %p3053_p7 = pnand %p3051_p5, %p3048_p2 }
  0x68   : > { %3056 = shalt.err (!%p3053_p7)
}
  0x69   : > { %s3057_s30 = scalar_lea.vmem %s415_s8, 768  ;;  %p3065_p11 = scmp.lt.s32.totalorder %s415_s8, %s415_s8 }
  0x6a   : > { %p3058_p9 = scmp.ne.s32.totalorder %s415_s8, %s3057_s30  ;;  %p3066_p12 = scmp.lt.s32.totalorder %s3057_s30, %s3057_s30 }
  0x6c   : > { %p3060_p4 = pnand %p3058_p9, %p3420_p8  ;;  %p3067_p1 = por %p3066_p12, %p3065_p11 }
  0x6e   : > { %p3061_p10 = pneg %p3060_p4 }
  0x70   : > { %p3068_p3 = pnand %p3067_p1, %p3061_p10 }
  0x72   : > { %3071 = shalt.err (!%p3068_p3)
}
  0x73   : > { %2749 = dma.hbm_to_vmem [thread:$0]  (!%p3404_p6), %s3884_s3, 768, %s415_s8, [#allocation6], %s3273_s15, %s3273_s15, %s3274_s12  }
  0x74   : > { %s3072_s17 = scalar_lea.hbm %s3888_s7, 768 }
  0x75   : > { %p3073_p1 = scmp.ne.s32.totalorder %s3888_s7, %s3072_s17  ;;  %p3079_p0 = scmp.lt.u32.totalorder %s3072_s17, %s3888_s7 }
  0x77   : > { %p3075_p3 = pnand %p3073_p1, %p3420_p8 }
  0x79   : > { %p3076_p13 = pneg %p3075_p3 }
  0x7b   : > { %p3081_p2 = pnand %p3079_p0, %p3076_p13 }
  0x7d   : > { %3084 = shalt.err (!%p3081_p2)
}
  0x7e   : > { %s3085_s23 = scalar_lea.vmem %s447_s16, 768  ;;  %p3093_p4 = scmp.lt.s32.totalorder %s447_s16, %s447_s16 }
  0x7f   : > { %p3086_p5 = scmp.ne.s32.totalorder %s447_s16, %s3085_s23  ;;  %p3094_p10 = scmp.lt.s32.totalorder %s3085_s23, %s3085_s23 }
  0x81   : > { %p3088_p7 = pnand %p3086_p5, %p3420_p8  ;;  %p3095_p11 = por %p3094_p10, %p3093_p4 }
  0x83   : > { %p3089_p9 = pneg %p3088_p7 }
  0x85   : > { %p3096_p12 = pnand %p3095_p11, %p3089_p9 }
  0x87   : > { %3099 = shalt.err (!%p3096_p12)
}
  0x88   : > { %2755 = dma.hbm_to_vmem [thread:$0]  (!%p3404_p6), %s3888_s7, 768, %s447_s16, [#allocation9], %s3273_s15, %s3273_s15, %s3274_s12  }
  0x89   : > { %s3277_s1 = smov [#allocation13]   ;;  %s3278_s6 = smov [#allocation14]  }
  0x8a   : > { %s478_s2 = sshll.u32 %s3277_s1, 4  ;;  %s494_s10 = sshll.u32 %s3278_s6, 4  ;;  %s479_s2 = int_to_ptr.vmem [resolvable:$true] %s478_s2  ;;  %s495_s10 = int_to_ptr.vmem [resolvable:$true] %s494_s10 }
  0x8b   : > { %s3100_s29 = scalar_lea.hbm %s3892_s11, 3072 }
  0x8c   : > { %p3101_p1 = scmp.ne.s32.totalorder %s3892_s11, %s3100_s29  ;;  %p3107_p0 = scmp.lt.u32.totalorder %s3100_s29, %s3892_s11 }
  0x8e   : > { %p3103_p3 = pnand %p3101_p1, %p3420_p8 }
  0x90   : > { %p3104_p13 = pneg %p3103_p3 }
  0x92   : > { %p3109_p2 = pnand %p3107_p0, %p3104_p13 }
  0x94   : > { %3112 = shalt.err (!%p3109_p2)
}
  0x95   : > { %s3113_s16 = scalar_lea.vmem %s479_s2, 3072  ;;  %p3121_p4 = scmp.lt.s32.totalorder %s479_s2, %s479_s2 }
  0x96   : > { %p3114_p5 = scmp.ne.s32.totalorder %s479_s2, %s3113_s16  ;;  %p3122_p10 = scmp.lt.s32.totalorder %s3113_s16, %s3113_s16 }
  0x98   : > { %p3116_p7 = pnand %p3114_p5, %p3420_p8  ;;  %p3123_p11 = por %p3122_p10, %p3121_p4 }
  0x9a   : > { %p3117_p9 = pneg %p3116_p7 }
  0x9c   : > { %p3124_p12 = pnand %p3123_p11, %p3117_p9 }
  0x9e   : > { %3127 = shalt.err (!%p3124_p12)
}
  0x9f   : > { %2761 = dma.hbm_to_vmem [thread:$0]  (!%p3404_p6), %s3892_s11, 3072, %s479_s2, [#allocation12], %s3273_s15, %s3273_s15, %s3274_s12  }
  0xa0   : > { %s3128_s22 = scalar_lea.hbm %s3894_s13, 3072 }
  0xa1   : > { %p3129_p1 = scmp.ne.s32.totalorder %s3894_s13, %s3128_s22  ;;  %p3135_p0 = scmp.lt.u32.totalorder %s3128_s22, %s3894_s13 }
  0xa3   : > { %p3131_p3 = pnand %p3129_p1, %p3420_p8 }
  0xa5   : > { %p3132_p13 = pneg %p3131_p3 }
  0xa7   : > { %p3137_p2 = pnand %p3135_p0, %p3132_p13 }
  0xa9   : > { %3140 = shalt.err (!%p3137_p2)
}
  0xaa   : > { %s3141_s8 = scalar_lea.vmem %s495_s10, 3072  ;;  %p3149_p4 = scmp.lt.s32.totalorder %s495_s10, %s495_s10 }
  0xab   : > { %p3142_p5 = scmp.ne.s32.totalorder %s495_s10, %s3141_s8  ;;  %p3150_p10 = scmp.lt.s32.totalorder %s3141_s8, %s3141_s8 }
  0xad   : > { %p3144_p7 = pnand %p3142_p5, %p3420_p8  ;;  %p3151_p11 = por %p3150_p10, %p3149_p4 }
  0xaf   : > { %p3145_p9 = pneg %p3144_p7 }
  0xb1   : > { %p3152_p12 = pnand %p3151_p11, %p3145_p9 }
  0xb3   : > { %3155 = shalt.err (!%p3152_p12)
}
  0xb4   : > { %2764 = dma.hbm_to_vmem [thread:$0]  (!%p3404_p6), %s3894_s13, 3072, %s495_s10, [#allocation15], %s3273_s15, %s3273_s15, %s3274_s12  }
  0xb5   : > { %s2289_s28 = sadd.s32 4294967294, %s3268_s21   ;;  %s3582_s26 = sadd.s32 1, %s3268_s21  }
  0xb6   : > { %s42_s30 = sadd.s32 1, %s3264_s20  ;;  %s39_s1 = ssub.s32 %s3268_s21, %s3582_s26 }
  0xb7   : > { %p49_p8 = scmp.ne.s32.totalorder %s3264_s20, %s3260_s19  ;;  %p40_p1 = scmp.eq.s32.totalorder %s39_s1, 0 }
  0xb8   : > { %p50_p3 = scmp.eq.s32.totalorder %s3268_s21, 0  ;;  %p55_p13 = scmp.ne.s32.totalorder %s3260_s19, %s3256_s18 }
  0xb9   : > { %p373_p0 = scmp.eq.s32.totalorder %s3388_s24, 1  ;;  %p3913_p5 = scmp.eq.s32.totalorder %s3388_s24, 0 }
  0xba   : > { %s3594_s6 = scalar_select %p40_p1, %s3264_s20, %s42_s30  }
  0xbb   : > { %p51_p2 = por %p50_p3, %p49_p8  ;;  %p3598_p7 = por %p3913_p5, %p55_p13 }
  0xbc   : > { %p3602_p6 = por %p373_p0, %p49_p8  ;;  %p379_p9 = scmp.eq.s32.totalorder %s2289_s28, 1 }
  0xbd   : > { %p2780_p4 = scmp.lt.s32.totalorder %s3268_s21, 2  ;;  %s511_s12 = sand.u32 1, %s3264_s20  }
  0xbe   : > { %s3915_s15 = scalar_select %p3602_p6, 1, 0 }
  0xbf   : > { %p3608_p10 = por %p379_p9, %p55_p13  ;;  %s2299_s22 = sshll.u32 %s511_s12, 4 }
  0xc0   : > { %s2437_s29 = sshll.u32 %s3268_s21, 8  ;;  %s515_s8 = scalar_lea.vmem [#allocation2], %s2299_s22 }
  0xc1   : > { %s3916_s10 = scalar_select %p3608_p10, 1, 0 }
  0xc2   : > { %s3616_s23 = scalar_lea.hbm %s3881_s0, %s2437_s29  ;;  %s522_s2 = sshll.u32 %s515_s8, 4  ;;  %s3622_s2 = int_to_ptr.vmem [resolvable:$true] %s522_s2 }
  0xc3   : > { %p3618_p11 = pnand %p2780_p4, %p51_p2  ;;  %s3624_s28 = scalar_lea.sflag [#allocation3], %s511_s12 }
  0xc4   : > { %s3156_s30 = scalar_lea.hbm %s3616_s23, 256  ;;  %s3161_s29 = scalar_lea.hbm %s3881_s0, 512 }
  0xc5   : > { %p3157_p12 = scmp.ne.s32.totalorder %s3616_s23, %s3156_s30  ;;  %p3158_p8 = pneg %p3618_p11 }
  0xc6   : > { %p3162_p13 = scmp.lt.u32.totalorder %s3616_s23, %s3881_s0  ;;  %p3163_p0 = scmp.lt.u32.totalorder %s3161_s29, %s3156_s30 }
  0xc7   : > { %p3159_p1 = pnand %p3158_p8, %p3157_p12  ;;  %p3165_p5 = scmp.lt.u32.totalorder %s3156_s30, %s3616_s23 }
  0xc8   : > { %p3164_p2 = por %p3163_p0, %p3162_p13 }
  0xc9   : > { %p3160_p3 = pneg %p3159_p1 }
  0xca   : > { %p3166_p9 = por %p3165_p5, %p3164_p2 }
  0xcc   : > { %p3167_p4 = pnand %p3166_p9, %p3160_p3 }
  0xce   : > { %3170 = shalt.err (!%p3167_p4)
}
  0xcf   : > { %s3171_s12 = scalar_lea.vmem %s3622_s2, 256  ;;  %s3279_s8 = smov [#allocation2]  }
  0xd0   : > { %p3172_p12 = scmp.ne.s32.totalorder %s3622_s2, %s3171_s12  ;;  %s3176_s1 = sshll.u32 %s3279_s8, 4  ;;  %s3177_s1 = int_to_ptr.vmem [resolvable:$false] %s3176_s1 }
  0xd1   : > { %s3178_s22 = scalar_lea.vmem %s3177_s1, 512  ;;  %p3179_p6 = scmp.lt.s32.totalorder %s3622_s2, %s3177_s1 }
  0xd2   : > { %p3174_p1 = pnand %p3172_p12, %p3158_p8  ;;  %p3180_p13 = scmp.lt.s32.totalorder %s3178_s22, %s3171_s12 }
  0xd4   : > { %p3175_p10 = pneg %p3174_p1  ;;  %p3181_p0 = por %p3180_p13, %p3179_p6 }
  0xd6   : > { %p3182_p2 = pnand %p3181_p0, %p3175_p10 }
  0xd8   : > { %3185 = shalt.err (!%p3182_p2)
}
  0xd9   : > { %s3280_s30 = smov 128   ;;  %s3281_s29 = smov 8  }
  0xda   : > { %2768 = dma.hbm_to_vmem [thread:$0]  (!%p3618_p11), %s3616_s23, 256, %s3622_s2, %s3624_s28, %s3280_s30, %s3280_s30, %s3281_s29  }
  0xdb   : > { %p3918_p8 = scmp.ne.s32.totalorder %s3909_s25, 0 }
  0xdc   : > { %s3655_s14 = sand.u32 (!%p3918_p8), 1, %s3260_s19  }
  0xdd   : > { %534 = sbr.rel (%p3918_p8) target bundleno = 1543 (0x607), region = 80  ;;  %s2303_s27 = sshll.u32 (!%p3918_p8), %s3655_s14, 4 }
  0xde   : > { %s537_s12 = scalar_lea.sflag (!%p3918_p8), [#allocation3], %s3655_s14  ;;  %s540_s8 = scalar_lea.vmem (!%p3918_p8), [#allocation2], %s2303_s27 }
  0xe4   : > { %3231 = dma.done.wait (%p3598_p7), %s537_s12, 256  }
  0xe5   : > { %3233 = vsyncadd (%p3598_p7), %s537_s12, 4294967040  ;;  %p3919_p6 = scmp.eq.s32.totalorder %s3388_s24, 0 }
  0xe7   : > { %3235 = dma.done.wait (%p3919_p6), [#allocation6], 1536   ;;  %p3920_p10 = pmov %p3919_p6 }
  0xe8   : > { %p3921_p11 = pmov %p3919_p6 }
  0xe9   : > { %3237 = vsyncadd (%p3920_p10), [#allocation6], 4294965760 }
  0xea   : > { %3239 = dma.done.wait (%p3921_p11), [#allocation9], 3840   ;;  %p3922_p3 = pmov %p3919_p6 }
  0xec   : > { %3241 = vsyncadd (%p3922_p3), [#allocation9], 4294963456  ;;  %p3923_p5 = pmov %p3922_p3 }
  0xed   : > { %p3924_p9 = pmov %p3922_p3 }
  0xee   : > { %3243 = dma.done.wait (%p3923_p5), [#allocation12], 6144  }
  0xef   : > { %3245 = vsyncadd (%p3924_p9), [#allocation12], 4294961152  ;;  %p3925_p7 = pmov %p3922_p3 }
  0xf0   : > { %p3926_p4 = pmov %p3922_p3 }
  0xf1   : > { %3247 = dma.done.wait (%p3925_p7), [#allocation15], 3072  }
  0xf2   : > { %3249 = vsyncadd (%p3926_p4), [#allocation15], 4294964224  ;;  %v617_v0 = vlaneseq  ;;  %v3282_v1 = vmov 0.0   ;;  %v3684_v3 = vld [vmem:[%s540_s8] sm:$0xff]  ;;  %v3686_v4 = vld [vmem:[%s540_s8 + $0x8] sm:$0xff]  ;;  %vm3283_vm2 = vmmov 0  }
  0xf3   : > { %2583 = vmatprep.subr.bf16.mxu0 %v3282_v1  ;;  %2599 = vmatprep.subr.bf16.mxu1 %v3282_v1  ;;  %v633_v5 = vrot.slane %v3684_v3, 1  ;;  %v634_v6 = vrot.slane %v3686_v4, 1  ;;  %v638_v7 = vrot.slane %v3684_v3, 2  ;;  %v639_v8 = vrot.slane %v3686_v4, 2  ;;  %v2846_v9 = vld [vmem:[#allocation5] sm:$0xff]   ;;  %v2847_v14 = vld [vmem:[#allocation7] sm:$0xff]  }
  0xf4   : > { %v3681_v2 = vshrl.u32 %v617_v0, 7  ;;  %2595 = vmatprep.mubr.msk.bf16.mxu0 %vm3283_vm2, %v3282_v1  ;;  %2611 = vmatprep.mubr.msk.bf16.mxu1 %vm3283_vm2, %v3282_v1  ;;  %v2848_v16 = vld [vmem:[#allocation5 + $0x8] sm:$0xff]   ;;  %v2849_v17 = vld [vmem:[#allocation7 + $0x8] sm:$0xff]   ;;  %s3284_s25 = smov 32   ;;  %v2850_v19 = vld [vmem:[#allocation5 + $0x10] sm:$0xff]   ;;  %s3285_s17 = smov 64  }
  0xf5   : > { %2584 = vmatpush3.bf16.msra.mxu0 %v2846_v9  ;;  %2600 = vmatpush3.bf16.msra.mxu1 %v2847_v14  ;;  %v2851_v20 = vld [vmem:[#allocation7 + $0x10] sm:$0xff]   ;;  %v2852_v21 = vld [vmem:[#allocation5 + $0x18] sm:$0xff]   ;;  %v2853_v22 = vld [vmem:[#allocation7 + $0x18] sm:$0xff]   ;;  %vm659_vm3 = vcmask 261120   ;;  %vm662_vm4 = vcmask 523264   ;;  %vm708_vm5 = vcmask 785408  }
  0xf6   : > { %vm635_vm0 = vcmp.lt.s32.totalorder %v3681_v2, 7  ;;  %vm640_vm1 = vcmp.lt.s32.totalorder %v3681_v2, 6  ;;  %2585 = vmatprep.subr.bf16.mxu0 %v3282_v1  ;;  %2601 = vmatprep.subr.bf16.mxu1 %v3282_v1  ;;  %v2854_v23 = vld [vmem:[#allocation5 + $0x20] sm:$0xff]   ;;  %v2855_v24 = vld [vmem:[#allocation7 + $0x20] sm:$0xff]   ;;  %v2856_v25 = vld [vmem:[#allocation5 + $0x28] sm:$0xff]   ;;  %s3927_s1 = sld [smem:[#allocation24_spill]] }
  0xf7   : > { %v636_v10 = vsel %vm635_vm0, %v633_v5, %v634_v6  ;;  %v637_v11 = vsel %vm635_vm0, %v634_v6, %v633_v5  ;;  %v641_v12 = vsel %vm640_vm1, %v638_v7, %v639_v8  ;;  %v642_v13 = vsel %vm640_vm1, %v639_v8, %v638_v7  ;;  %v2857_v26 = vld [vmem:[#allocation7 + $0x28] sm:$0xff]   ;;  %v2858_v27 = vld [vmem:[#allocation8 + $0x40] sm:$0xff]   ;;  %v2861_v41 = vld [vmem:[#allocation8 + $0x48] sm:$0xff]   ;;  %s3928_s29 = sld [smem:[#allocation25_spill]]  ;;  %s3929_s8 = sld [smem:[#allocation26_spill]] }
  0xf8   : > { %v2836_v15 = vpack.i.bf16 %v637_v11, %v636_v10  ;;  %v2841_v18 = vpack.i.bf16 %v642_v13, %v641_v12  ;;  %v2859_v38 = vld [vmem:[#allocation8] sm:$0xff]   ;;  %v2862_v42 = vld [vmem:[#allocation8 + $0x8] sm:$0xff]   ;;  %v2864_v44 = vld [vmem:[#allocation8 + $0x50] sm:$0xff]   ;;  %s3930_s23 = sld [smem:[#allocation27_spill]]  ;;  %s3931_s28 = sld [smem:[#allocation28_spill]] }
  0xf9   : > { %2586 = vmatpush3.bf16.msra.mxu0 %v2848_v16  ;;  %2602 = vmatpush3.bf16.msra.mxu1 %v2849_v17  ;;  %v2860_v39 = vld [vmem:[#allocation8 + $0x80] sm:$0xff]   ;;  %v2863_v43 = vld [vmem:[#allocation8 + $0x88] sm:$0xff]   ;;  %v2865_v45 = vld [vmem:[#allocation8 + $0x10] sm:$0xff]   ;;  %s3932_s30 = sld [smem:[#allocation29_spill]]  ;;  %s613_s27 = scalar_lea.vmem [#allocation16], %s3655_s14 }
  0xfa   : > { %2837 = vrot.lane.b32.xlu0 %v2836_v15, %s3284_s25  ;;  %2587 = vmatprep.subr.bf16.mxu0 %v3282_v1  ;;  %v2866_v46 = vld [vmem:[#allocation8 + $0x90] sm:$0xff]   ;;  %v2867_v47 = vld [vmem:[#allocation8 + $0x58] sm:$0xff]   ;;  %v2870_v50 = vld [vmem:[#allocation8 + $0x60] sm:$0xff]   ;;  %s2156_s12 = sshll.u32 %s613_s27, 4  ;;  %p3934_p1 = scmp.ne.s32.totalorder %s3915_s15, 0  ;;  %s3839_s12 = int_to_ptr.vmem [resolvable:$true] %s2156_s12 }
  0xfb   : > { %2603 = vmatprep.subr.bf16.mxu1 %v3282_v1  ;;  %v2868_v48 = vld [vmem:[#allocation8 + $0x18] sm:$0xff]   ;;  %v2871_v51 = vld [vmem:[#allocation8 + $0x20] sm:$0xff]   ;;  %v2873_v53 = vld [vmem:[#allocation8 + $0x68] sm:$0xff]   ;;  %s3186_s2 = scalar_lea.vmem %s3839_s12, 16  ;;  %s3286_s16 = smov [#allocation16]  }
  0xfc   : > { %v2869_v49 = vld [vmem:[#allocation8 + $0x98] sm:$0xff]   ;;  %v2872_v52 = vld [vmem:[#allocation8 + $0xa0] sm:$0xff]   ;;  %v2874_v54 = vld [vmem:[#allocation8 + $0x28] sm:$0xff]   ;;  %p3187_p12 = scmp.ne.s32.totalorder %s3839_s12, %s3186_s2 }
  0xfd   : > { %2588 = vmatpush3.bf16.msra.mxu0 %v2850_v19  ;;  %2604 = vmatpush3.bf16.msra.mxu1 %v2851_v20  ;;  %v2875_v55 = vld [vmem:[#allocation8 + $0xa8] sm:$0xff]   ;;  %v2876_v56 = vld [vmem:[#allocation8 + $0x70] sm:$0xff]   ;;  %v2879_v59 = vld [vmem:[#allocation8 + $0x78] sm:$0xff]  }
  0xfe   : > { %2842 = vrot.lane.b32.xlu0 %v2841_v18, %s3285_s17  ;;  %2589 = vmatprep.subr.bf16.mxu0 %v3282_v1  ;;  %v2877_v57 = vld [vmem:[#allocation8 + $0x30] sm:$0xff]   ;;  %v2880_v60 = vld [vmem:[#allocation8 + $0x38] sm:$0xff]   ;;  %v2319_v62 = vld [vmem:[%s3885_s4] ss:$0 sm:$0xff]  ;;  %s3933_s17 = sld [smem:[#allocation30_spill]]  ;;  %p3188_p13 = pnand %p3187_p12, %p3934_p1 }
  0xff   : > { %2605 = vmatprep.subr.bf16.mxu1 %v3282_v1  ;;  %v2878_v58 = vld [vmem:[#allocation8 + $0xb0] sm:$0xff]   ;;  %v2881_v61 = vld [vmem:[#allocation8 + $0xb8] sm:$0xff]   ;;  %v2311_v63 = vld [vmem:[%s3927_s1] ss:$0 sm:$0xff] }
 0x100   : > { %p3189_p0 = pneg %p3188_p13 }
 0x101   : > { %2590 = vmatpush3.bf16.msra.mxu0 %v2852_v21  ;;  %2606 = vmatpush3.bf16.msra.mxu1 %v2853_v22 }
 0x102   : > { %2591 = vmatprep.subr.bf16.mxu0 %v3282_v1  ;;  %2607 = vmatprep.subr.bf16.mxu1 %v3282_v1 }
 0x105   : > { %2592 = vmatpush3.bf16.msra.mxu0 %v2854_v23  ;;  %2608 = vmatpush3.bf16.msra.mxu1 %v2855_v24 }
 0x106   : > { %2593 = vmatprep.subr.bf16.mxu0 %v3282_v1  ;;  %2609 = vmatprep.subr.bf16.mxu1 %v3282_v1 }
 0x109   : > { %2594 = vmatpush3.bf16.msra.mxu0 %v2856_v25  ;;  %2610 = vmatpush3.bf16.msra.mxu1 %v2857_v26 }
 0x10a   : > { %2452 = vmatprep.subr.bf16.mxu0 %v2858_v27  ;;  %2615 = vmatprep.subr.bf16.mxu1 %v3282_v1 }
 0x16c   : > { %v2838_v28 = vpop.permute.xlu0 %2837 }
 0x16d   : > { %v2840_v29 = vunpack.i.h.bf16 %v2838_v28  ;;  %v2839_v30 = vunpack.i.l.bf16 %v2838_v28 }
 0x16f   : > { %v661_v34 = vsel %vm659_vm3, %v3686_v4, %v2840_v29  ;;  %v660_v35 = vsel %vm659_vm3, %v3684_v3, %v2839_v30  ;;  %v3741_v4 = vadd.s32 8, %v3681_v2  ;;  %v2941_v2 = vld [vmem:[#allocation14 + $0x10] sm:$0xff]  }
 0x170   : > { %v2843_v31 = vpop.permute.xlu0 %2842 }
 0x171   : > { %v2845_v32 = vunpack.i.h.bf16 %v2843_v31  ;;  %v2844_v33 = vunpack.i.l.bf16 %v2843_v31  ;;  %vm756_vm6 = vcmp.lt.s32.totalorder %v3741_v4, 14  ;;  %vm1159_vm7 = vcmp.lt.s32.totalorder %v3741_v4, 12 }
 0x172   : > { %vm1856_vm8 = vcmp.lt.s32.totalorder %v3741_v4, 10 }
 0x173   : > { %v663_v36 = vsel %vm662_vm4, %v660_v35, %v2844_v33  ;;  %v664_v37 = vsel %vm662_vm4, %v661_v34, %v2845_v32  ;;  %v2882_v32 = vld [vmem:[#allocation10] sm:$0xff]   ;;  %v2883_v33 = vld [vmem:[#allocation10 + $0x8] sm:$0xff]   ;;  %v2884_v34 = vld [vmem:[#allocation10 + $0x10] sm:$0xff]  }
 0x174   : > { %v3718_v40 = vpack.c.bf16 %v664_v37, %v663_v36  ;;  %v2885_v35 = vld [vmem:[#allocation10 + $0x18] sm:$0xff]   ;;  %v2886_v36 = vld [vmem:[#allocation10 + $0x20] sm:$0xff]   ;;  %v2887_v37 = vld [vmem:[#allocation10 + $0x28] sm:$0xff]  }
 0x176   : > { %2596 = vmatmul.mubr.msk.bf16.vlgmr.msra.gmra.mrb[0].mxu0 %vm708_vm5, %v3718_v40  ;;  %2612 = vmatmul.mubr.msk.bf16.vlgmr.msra.gmra.mrb[0].mxu1 %vm708_vm5, %v3718_v40 }
 0x177   : > { %2453 = vmatpush3.bf16.msra.mxu0 %v2859_v38  ;;  %2616 = vmatpush3.bf16.msra.mxu1 %v2860_v39  ;;  %v2888_v38 = vld [vmem:[#allocation11 + $0x40] sm:$0xff]  }
 0x178   : > { %2454 = vmatprep.subr.bf16.mxu0 %v2861_v41  ;;  %2617 = vmatprep.subr.bf16.mxu1 %v3282_v1  ;;  %v2889_v39 = vld [vmem:[#allocation11 + $0x80] sm:$0xff]  }
 0x179   : > { %2631 = vmatprep.mubr.msk.bf16.mxu1 %vm3283_vm2, %v3282_v1  ;;  %v2890_v41 = vld [vmem:[#allocation11] sm:$0xff]  }
 0x17b   : > { %2455 = vmatpush3.bf16.msra.mxu0 %v2862_v42  ;;  %2618 = vmatpush3.bf16.msra.mxu1 %v2863_v43  ;;  %v2891_v42 = vld [vmem:[#allocation11 + $0x48] sm:$0xff]  }
 0x17c   : > { %2456 = vmatprep.subr.bf16.mxu0 %v2864_v44  ;;  %2619 = vmatprep.subr.bf16.mxu1 %v3282_v1  ;;  %v2892_v43 = vld [vmem:[#allocation11 + $0x88] sm:$0xff]  }
 0x17d   : > { %v2893_v44 = vld [vmem:[#allocation11 + $0x8] sm:$0xff]  }
 0x17f   : > { %2457 = vmatpush3.bf16.msra.mxu0 %v2865_v45  ;;  %2620 = vmatpush3.bf16.msra.mxu1 %v2866_v46  ;;  %v2895_v45 = vld [vmem:[#allocation11 + $0x90] sm:$0xff]  }
 0x180   : > { %2458 = vmatprep.subr.bf16.mxu0 %v2867_v47  ;;  %2621 = vmatprep.subr.bf16.mxu1 %v3282_v1  ;;  %v2896_v46 = vld [vmem:[#allocation11 + $0x10] sm:$0xff]   ;;  %v2897_v47 = vld [vmem:[#allocation11 + $0x58] sm:$0xff]  }
 0x183   : > { %2459 = vmatpush3.bf16.msra.mxu0 %v2868_v48  ;;  %2622 = vmatpush3.bf16.msra.mxu1 %v2869_v49  ;;  %v2898_v48 = vld [vmem:[#allocation11 + $0x98] sm:$0xff]  }
 0x184   : > { %2460 = vmatprep.subr.bf16.mxu0 %v2870_v50  ;;  %2623 = vmatprep.subr.bf16.mxu1 %v3282_v1  ;;  %v2899_v49 = vld [vmem:[#allocation11 + $0x18] sm:$0xff]   ;;  %v2900_v50 = vld [vmem:[#allocation11 + $0x60] sm:$0xff]  }
 0x187   : > { %2461 = vmatpush3.bf16.msra.mxu0 %v2871_v51  ;;  %2624 = vmatpush3.bf16.msra.mxu1 %v2872_v52  ;;  %v2901_v51 = vld [vmem:[#allocation11 + $0xa0] sm:$0xff]  }
 0x188   : > { %2625 = vmatprep.subr.bf16.mxu1 %v3282_v1  ;;  %2462 = vmatprep.subr.bf16.mxu0 %v2873_v53  ;;  %v2902_v52 = vld [vmem:[#allocation11 + $0x20] sm:$0xff]   ;;  %v2903_v53 = vld [vmem:[#allocation11 + $0x68] sm:$0xff]  }
 0x18b   : > { %2463 = vmatpush3.bf16.msra.mxu0 %v2874_v54  ;;  %2626 = vmatpush3.bf16.msra.mxu1 %v2875_v55  ;;  %v2904_v54 = vld [vmem:[#allocation11 + $0xa8] sm:$0xff]  }
 0x18c   : > { %2627 = vmatprep.subr.bf16.mxu1 %v3282_v1  ;;  %2464 = vmatprep.subr.bf16.mxu0 %v2876_v56  ;;  %v2905_v55 = vld [vmem:[#allocation11 + $0x28] sm:$0xff]   ;;  %v2906_v56 = vld [vmem:[#allocation11 + $0x70] sm:$0xff]  }
 0x18f   : > { %2465 = vmatpush3.bf16.msra.mxu0 %v2877_v57  ;;  %2628 = vmatpush3.bf16.msra.mxu1 %v2878_v58  ;;  %v2907_v57 = vld [vmem:[#allocation11 + $0xb0] sm:$0xff]  }
 0x190   : > { %2629 = vmatprep.subr.bf16.mxu1 %v3282_v1  ;;  %2466 = vmatprep.subr.bf16.mxu0 %v2879_v59  ;;  %v2908_v58 = vld [vmem:[#allocation11 + $0x30] sm:$0xff]   ;;  %v2909_v59 = vld [vmem:[#allocation11 + $0x78] sm:$0xff]  }
 0x193   : > { %2467 = vmatpush3.bf16.msra.mxu0 %v2880_v60  ;;  %2630 = vmatpush3.bf16.msra.mxu1 %v2881_v61  ;;  %v2910_v60 = vld [vmem:[#allocation11 + $0xb8] sm:$0xff]  }
 0x194   : > { %2635 = vmatprep.subr.bf16.mxu0 %v3282_v1  ;;  %2490 = vmatprep.subr.bf16.mxu1 %v2888_v38  ;;  %v2911_v61 = vld [vmem:[#allocation11 + $0x38] sm:$0xff]  }
 0x249   : > { %v746_v0 = vpop.f32.mrb[0].mxu0  ;;  %v855_v3 = vpop.f32.mrb[0].mxu1 }
 0x24a   : > { %v856_v5 = vadd.f32 %v2319_v62, %v855_v3  ;;  %v2597_v6 = vpop.f32.mrb[1].mxu0  ;;  %v2613_v7 = vpop.f32.mrb[1].mxu1  ;;  %v747_v8 = vadd.f32 %v2311_v63, %v746_v0 }
 0x24b   : > { %v749_v9 = vpop.f32.mrb[2].mxu0  ;;  %v858_v10 = vpop.f32.mrb[2].mxu1 }
 0x24c   : > { %v862_v11 = vmax.f32 %v856_v5, 0.0  ;;  %v750_v12 = vadd.f32 %v2311_v63, %v749_v9  ;;  %v859_v13 = vadd.f32 %v2319_v62, %v858_v10  ;;  %v2598_v14 = vpop.f32.mrb[3].mxu0  ;;  %v2614_v15 = vpop.f32.mrb[3].mxu1  ;;  %v753_v18 = vmax.f32 %v747_v8, 0.0  ;;  %v2912_v62 = vld [vmem:[#allocation13 + $0x40] sm:$0xff]  }
 0x24d   : > { %v2327_v5 = vld [vmem:[%s3928_s29] ss:$0 sm:$0xff]  ;;  %s2434_s29 = sshll.u32 %s3388_s24, 4  ;;  %s2144_s24 = scalar_lea.sflag [#allocation4], %s3655_s14 }
 0x24e   : > { %v754_v16 = vmax.f32 %v750_v12, 0.0  ;;  %v863_v17 = vmax.f32 %v859_v13, 0.0  ;;  %v913_v19 = vrot.slane %v862_v11, 1  ;;  %v917_v20 = vrot.slane %v862_v11, 2 }
 0x250   : > { %v758_v21 = vsel %vm756_vm6, %v754_v16, 0.0  ;;  %v914_v22 = vrot.slane %v863_v17, 1  ;;  %v918_v23 = vrot.slane %v863_v17, 2  ;;  %v921_v24 = vpack.c.bf16 %v863_v17, %v862_v11 }
 0x251   : > { %v3744_v25 = vmax.f32 %v753_v18, %v758_v21  ;;  %v2352_v21 = vld [vmem:[%s3929_s8] ss:$0 sm:$0xff] }
 0x252   : > { %v915_v26 = vsel %vm635_vm0, %v913_v19, %v914_v22  ;;  %v916_v27 = vsel %vm635_vm0, %v914_v22, %v913_v19  ;;  %v919_v28 = vsel %vm640_vm1, %v917_v20, %v918_v23  ;;  %v920_v29 = vsel %vm640_vm1, %v918_v23, %v917_v20 }
 0x253   : > { %v922_v30 = vpack.c.bf16 %v916_v27, %v915_v26  ;;  %v923_v31 = vpack.c.bf16 %v920_v29, %v919_v28 }
 0x255   : > { %1106 = vmatprep.mubr.bf16.mxu0 %v922_v30  ;;  %2632 = vmatmul.mubr.bf16.vlgmr.msra.gmra.mrb[4].mxu1 %v923_v31 }
 0x256   : > { %1107 = vmatmul.mubr.bf16.vlgmr.msra.gmra.mrb[4].mxu0 %v921_v24  ;;  %2491 = vmatpush3.bf16.msra.mxu1 %v2890_v41  ;;  %v2914_v41 = vld [vmem:[#allocation13 + $0x80] sm:$0xff]  }
 0x257   : > { %2636 = vmatpush3.bf16.msra.mxu0 %v2882_v32  ;;  %2647 = vmatprep.mubr.msk.bf16.mxu0 %vm3283_vm2, %v3282_v1 }
 0x258   : > { %2637 = vmatprep.subr.bf16.mxu0 %v3282_v1  ;;  %2492 = vmatprep.subr.bf16.mxu1 %v2891_v42 }
 0x25a   : > { %2493 = vmatpush3.bf16.msra.mxu1 %v2893_v44  ;;  %v2913_v44 = vld [vmem:[#allocation13] sm:$0xff]  }
 0x25b   : > { %2638 = vmatpush3.bf16.msra.mxu0 %v2883_v33 }
 0x25c   : > { %2639 = vmatprep.subr.bf16.mxu0 %v3282_v1 }
 0x25f   : > { %2640 = vmatpush3.bf16.msra.mxu0 %v2884_v34 }
 0x260   : > { %2641 = vmatprep.subr.bf16.mxu0 %v3282_v1 }
 0x263   : > { %2642 = vmatpush3.bf16.msra.mxu0 %v2885_v35 }
 0x264   : > { %2643 = vmatprep.subr.bf16.mxu0 %v3282_v1 }
 0x267   : > { %2644 = vmatpush3.bf16.msra.mxu0 %v2886_v36 }
 0x268   : > { %2645 = vmatprep.subr.bf16.mxu0 %v3282_v1 }
 0x26b   : > { %2646 = vmatpush3.bf16.msra.mxu0 %v2887_v37 }
 0x26c   : > { %2651 = vmatprep.subr.bf16.mxu0 %v3282_v1 }
 0x26e   : > { %2648 = vmatmul.mubr.msk.bf16.vlgmr.msra.gmra.mrb[8].mxu0 %vm708_vm5, %v3718_v40  ;;  %v2894_v40 = vld [vmem:[#allocation11 + $0x50] sm:$0xff]  }
 0x26f   : > { %2667 = vmatprep.mubr.msk.bf16.mxu0 %vm3283_vm2, %v3282_v1  ;;  %2652 = vmatpush3.bf16.msra.mxu0 %v2889_v39 }
 0x270   : > { %2653 = vmatprep.subr.bf16.mxu0 %v3282_v1  ;;  %2494 = vmatprep.subr.bf16.mxu1 %v2894_v40  ;;  %v2915_v40 = vld [vmem:[#allocation13 + $0x48] sm:$0xff]  }
 0x271   : > { %2495 = vmatpush3.bf16.msra.mxu1 %v2896_v46  ;;  %v2916_v46 = vld [vmem:[#allocation13 + $0x8] sm:$0xff]  }
 0x272   : > { %2496 = vmatprep.subr.bf16.mxu1 %v2897_v47  ;;  %v2918_v47 = vld [vmem:[#allocation13 + $0x50] sm:$0xff]  }
 0x273   : > { %2654 = vmatpush3.bf16.msra.mxu0 %v2892_v43 }
 0x274   : > { %2655 = vmatprep.subr.bf16.mxu0 %v3282_v1 }
 0x275   : > { %2497 = vmatpush3.bf16.msra.mxu1 %v2899_v49  ;;  %v2919_v49 = vld [vmem:[#allocation13 + $0x10] sm:$0xff]  }
 0x276   : > { %2498 = vmatprep.subr.bf16.mxu1 %v2900_v50  ;;  %v2921_v50 = vld [vmem:[#allocation13 + $0x58] sm:$0xff]  }
 0x277   : > { %2656 = vmatpush3.bf16.msra.mxu0 %v2895_v45  ;;  %v2917_v45 = vld [vmem:[#allocation13 + $0x88] sm:$0xff]  }
 0x278   : > { %2657 = vmatprep.subr.bf16.mxu0 %v3282_v1 }
 0x279   : > { %2499 = vmatpush3.bf16.msra.mxu1 %v2902_v52  ;;  %v2922_v52 = vld [vmem:[#allocation13 + $0x18] sm:$0xff]  }
 0x27a   : > { %2500 = vmatprep.subr.bf16.mxu1 %v2903_v53  ;;  %v2924_v53 = vld [vmem:[#allocation13 + $0x60] sm:$0xff]  }
 0x27b   : > { %2658 = vmatpush3.bf16.msra.mxu0 %v2898_v48  ;;  %v2920_v48 = vld [vmem:[#allocation13 + $0x90] sm:$0xff]  }
 0x27c   : > { %2659 = vmatprep.subr.bf16.mxu0 %v3282_v1 }
 0x27d   : > { %2501 = vmatpush3.bf16.msra.mxu1 %v2905_v55  ;;  %v2926_v55 = vld [vmem:[#allocation13 + $0xa0] sm:$0xff]  }
 0x27e   : > { %2502 = vmatprep.subr.bf16.mxu1 %v2906_v56  ;;  %v2927_v56 = vld [vmem:[#allocation13 + $0x68] sm:$0xff]  }
 0x27f   : > { %2660 = vmatpush3.bf16.msra.mxu0 %v2901_v51  ;;  %v2923_v51 = vld [vmem:[#allocation13 + $0x98] sm:$0xff]  }
 0x280   : > { %2661 = vmatprep.subr.bf16.mxu0 %v3282_v1 }
 0x281   : > { %2503 = vmatpush3.bf16.msra.mxu1 %v2908_v58  ;;  %v2929_v58 = vld [vmem:[#allocation13 + $0xa8] sm:$0xff]  }
 0x282   : > { %2504 = vmatprep.subr.bf16.mxu1 %v2909_v59  ;;  %v2930_v59 = vld [vmem:[#allocation13 + $0x70] sm:$0xff]  }
 0x283   : > { %2662 = vmatpush3.bf16.msra.mxu0 %v2904_v54  ;;  %v2925_v54 = vld [vmem:[#allocation13 + $0x20] sm:$0xff]  }
 0x284   : > { %2663 = vmatprep.subr.bf16.mxu0 %v3282_v1 }
 0x285   : > { %2505 = vmatpush3.bf16.msra.mxu1 %v2911_v61  ;;  %v2932_v61 = vld [vmem:[#allocation13 + $0xb0] sm:$0xff]  }
 0x286   : > { %2521 = vmatprep.subr.bf16.mxu1 %v2912_v62  ;;  %v2933_v62 = vld [vmem:[#allocation13 + $0x78] sm:$0xff]  }
 0x287   : > { %2664 = vmatpush3.bf16.msra.mxu0 %v2907_v57  ;;  %v2928_v57 = vld [vmem:[#allocation13 + $0x28] sm:$0xff]  }
 0x288   : > { %2665 = vmatprep.subr.bf16.mxu0 %v3282_v1 }
 0x28b   : > { %2666 = vmatpush3.bf16.msra.mxu0 %v2910_v60  ;;  %v2931_v60 = vld [vmem:[#allocation13 + $0x30] sm:$0xff]  }
 0x28c   : > { %2671 = vmatprep.subr.bf16.mxu0 %v3282_v1 }
 0x328   : > { %v1149_v63 = vpop.f32.mrb[4].mxu1 }
 0x329   : > { %v2468_v0 = vpop.f32.mrb[4].mxu0  ;;  %v2633_v3 = vpop.f32.mrb[5].mxu1 }
 0x32a   : > { %v2469_v6 = vpop.f32.mrb[5].mxu0  ;;  %v1152_v7 = vpop.f32.mrb[6].mxu1  ;;  %v2936_v3 = vld [vmem:[#allocation14 + $0x40] sm:$0xff]  }
 0x32b   : > { %v2470_v8 = vadd.f32 %v2469_v6, %v2468_v0  ;;  %v2471_v9 = vpop.f32.mrb[6].mxu0  ;;  %v2634_v10 = vpop.f32.mrb[7].mxu1  ;;  %v2935_v0 = vld [vmem:[#allocation13 + $0xb8] sm:$0xff]  }
 0x32c   : > { %v2472_v11 = vpop.f32.mrb[7].mxu0  ;;  %v2360_v10 = vld [vmem:[%s3930_s23] ss:$0 sm:$0xff]  ;;  %s3837_s23 = scalar_lea.hbm %s3933_s17, %s2434_s29 }
 0x32d   : > { %v1109_v12 = vadd.f32 %v2470_v8, %v2327_v5  ;;  %v2473_v13 = vadd.f32 %v2472_v11, %v2471_v9 }
 0x32f   : > { %v1150_v14 = vadd.f32 %v1149_v63, %v1109_v12  ;;  %v1112_v15 = vadd.f32 %v2473_v13, %v2327_v5  ;;  %v2934_v63 = vld [vmem:[#allocation13 + $0x38] sm:$0xff]  }
 0x331   : > { %v1153_v16 = vadd.f32 %v1152_v7, %v1112_v15  ;;  %v1156_v18 = vmax.f32 %v1150_v14, 0.0 }
 0x333   : > { %v1157_v17 = vmax.f32 %v1153_v16, 0.0 }
 0x335   : > { %v1161_v19 = vsel %vm1159_vm7, %v1157_v17, 0.0 }
 0x336   : > { %v3778_v20 = vmax.f32 %v1156_v18, %v1161_v19 }
 0x338   : > { %v1163_v5 = vrot.slane %v3778_v20, 4 }
 0x33a   : > { %v1164_v6 = vmax.f32 %v3778_v20, %v1163_v5  ;;  %v2957_v5 = vld [vmem:[#allocation14 + $0xa8] sm:$0xff]  }
 0x33c   : > { %v1165_v13 = vrot.slane %v1164_v6, 2 }
 0x341   : > { %v1258_v22 = vpop.f32.mrb[8].mxu0 }
 0x342   : > { %v1259_v23 = vadd.f32 %v2352_v21, %v1258_v22  ;;  %v2649_v24 = vpop.f32.mrb[9].mxu0 }
 0x343   : > { %v1261_v26 = vpop.f32.mrb[10].mxu0 }
 0x344   : > { %v1265_v27 = vmax.f32 %v1259_v23, 0.0  ;;  %v1262_v28 = vadd.f32 %v2352_v21, %v1261_v26  ;;  %v2650_v29 = vpop.f32.mrb[11].mxu0  ;;  %v1166_v21 = vmax.f32 %v1164_v6, %v1165_v13  ;;  %v2958_v6 = vld [vmem:[#allocation14 + $0xb0] sm:$0xff]  }
 0x346   : > { %v1266_v30 = vmax.f32 %v1262_v28, 0.0  ;;  %v1316_v31 = vrot.slane %v1265_v27, 1  ;;  %v1320_v32 = vrot.slane %v1265_v27, 2  ;;  %v1167_v26 = vrot.slane %v1166_v21, 1 }
 0x348   : > { %v1317_v33 = vrot.slane %v1266_v30, 1  ;;  %v1321_v34 = vrot.slane %v1266_v30, 2  ;;  %v1324_v35 = vpack.c.bf16 %v1266_v30, %v1265_v27 }
 0x34a   : > { %v1318_v36 = vsel %vm635_vm0, %v1316_v31, %v1317_v33  ;;  %v1319_v37 = vsel %vm635_vm0, %v1317_v33, %v1316_v31  ;;  %v1322_v38 = vsel %vm640_vm1, %v1320_v32, %v1321_v34  ;;  %v1323_v39 = vsel %vm640_vm1, %v1321_v34, %v1320_v32 }
 0x34b   : > { %v1325_v42 = vpack.c.bf16 %v1319_v37, %v1318_v36  ;;  %v1326_v43 = vpack.c.bf16 %v1323_v39, %v1322_v38  ;;  %v1168_v33 = vmax.f32 %v1166_v21, %v1167_v26  ;;  %v2952_v38 = vld [vmem:[#allocation14 + $0x80] sm:$0xff]  }
 0x34d   : > { %1509 = vmatprep.mubr.bf16.mxu1 %v1325_v42  ;;  %2668 = vmatmul.mubr.bf16.vlgmr.msra.gmra.mrb[12].mxu0 %v1326_v43  ;;  %v2937_v42 = vld [vmem:[#allocation14] sm:$0xff]   ;;  %v2938_v43 = vld [vmem:[#allocation14 + $0x48] sm:$0xff]  }
 0x34e   : > { %1510 = vmatmul.mubr.bf16.vlgmr.msra.gmra.mrb[8].mxu1 %v1324_v35  ;;  %2672 = vmatpush3.bf16.msra.mxu0 %v2914_v41 }
 0x34f   : > { %2522 = vmatpush3.bf16.msra.mxu1 %v2913_v44  ;;  %2673 = vmatprep.subr.bf16.mxu0 %v3282_v1  ;;  %v1867_v44 = vpack.c.bf16 %v1168_v33, %v1168_v33 }
 0x350   : > { %2523 = vmatprep.subr.bf16.mxu1 %v2915_v40  ;;  %2687 = vmatprep.mubr.msk.bf16.mxu0 %vm3283_vm2, %v3282_v1  ;;  %v2939_v40 = vld [vmem:[#allocation14 + $0x8] sm:$0xff]  }
 0x352   : > { %2674 = vmatpush3.bf16.msra.mxu0 %v2917_v45  ;;  %v2940_v45 = vld [vmem:[#allocation14 + $0x50] sm:$0xff]  }
 0x353   : > { %2524 = vmatpush3.bf16.msra.mxu1 %v2916_v46  ;;  %2675 = vmatprep.subr.bf16.mxu0 %v3282_v1  ;;  %v760_v46 = vrot.slane %v3744_v25, 4 }
 0x354   : > { %2525 = vmatprep.subr.bf16.mxu1 %v2918_v47  ;;  %v2942_v47 = vld [vmem:[#allocation14 + $0x58] sm:$0xff]  }
 0x356   : > { %2676 = vmatpush3.bf16.msra.mxu0 %v2920_v48  ;;  %v2943_v48 = vld [vmem:[#allocation14 + $0x18] sm:$0xff]  }
 0x357   : > { %2526 = vmatpush3.bf16.msra.mxu1 %v2919_v49  ;;  %2677 = vmatprep.subr.bf16.mxu0 %v3282_v1  ;;  %v761_v49 = vmax.f32 %v3744_v25, %v760_v46 }
 0x358   : > { %2527 = vmatprep.subr.bf16.mxu1 %v2921_v50  ;;  %v2944_v50 = vld [vmem:[#allocation14 + $0x60] sm:$0xff]  }
 0x35a   : > { %2678 = vmatpush3.bf16.msra.mxu0 %v2923_v51  ;;  %v2945_v51 = vld [vmem:[#allocation14 + $0x20] sm:$0xff]  }
 0x35b   : > { %2528 = vmatpush3.bf16.msra.mxu1 %v2922_v52  ;;  %2679 = vmatprep.subr.bf16.mxu0 %v3282_v1  ;;  %v762_v52 = vrot.slane %v761_v49, 2 }
 0x35c   : > { %2529 = vmatprep.subr.bf16.mxu1 %v2924_v53  ;;  %v2946_v53 = vld [vmem:[#allocation14 + $0x68] sm:$0xff]  }
 0x35e   : > { %2680 = vmatpush3.bf16.msra.mxu0 %v2926_v55  ;;  %v763_v55 = vmax.f32 %v761_v49, %v762_v52 }
 0x35f   : > { %2530 = vmatpush3.bf16.msra.mxu1 %v2925_v54  ;;  %2681 = vmatprep.subr.bf16.mxu0 %v3282_v1  ;;  %v2947_v54 = vld [vmem:[#allocation14 + $0x28] sm:$0xff]  }
 0x360   : > { %2531 = vmatprep.subr.bf16.mxu1 %v2927_v56  ;;  %v2948_v56 = vld [vmem:[#allocation14 + $0x70] sm:$0xff]  }
 0x362   : > { %2682 = vmatpush3.bf16.msra.mxu0 %v2929_v58  ;;  %v2950_v58 = vld [vmem:[#allocation14 + $0x78] sm:$0xff]  }
 0x363   : > { %2532 = vmatpush3.bf16.msra.mxu1 %v2928_v57  ;;  %2683 = vmatprep.subr.bf16.mxu0 %v3282_v1  ;;  %v2949_v57 = vld [vmem:[#allocation14 + $0x30] sm:$0xff]  }
 0x364   : > { %2533 = vmatprep.subr.bf16.mxu1 %v2930_v59  ;;  %v764_v59 = vrot.slane %v763_v55, 1 }
 0x366   : > { %2684 = vmatpush3.bf16.msra.mxu0 %v2932_v61  ;;  %v765_v25 = vmax.f32 %v763_v55, %v764_v59 }
 0x367   : > { %2534 = vmatpush3.bf16.msra.mxu1 %v2931_v60  ;;  %2685 = vmatprep.subr.bf16.mxu0 %v3282_v1  ;;  %v2951_v60 = vld [vmem:[#allocation14 + $0x38] sm:$0xff]  }
 0x368   : > { %2535 = vmatprep.subr.bf16.mxu1 %v2933_v62  ;;  %v1866_v61 = vpack.c.bf16 %v765_v25, %v765_v25  ;;  %v2953_v62 = vld [vmem:[#allocation14 + $0x88] sm:$0xff]  }
 0x36a   : > { %2686 = vmatpush3.bf16.msra.mxu0 %v2935_v0  ;;  %v2955_v0 = vld [vmem:[#allocation14 + $0x98] sm:$0xff]  }
 0x36b   : > { %2536 = vmatpush3.bf16.msra.mxu1 %v2934_v63  ;;  %2691 = vmatprep.subr.bf16.mxu0 %v3282_v1  ;;  %v2954_v63 = vld [vmem:[#allocation14 + $0x90] sm:$0xff]  }
 0x36c   : > { %2552 = vmatprep.subr.bf16.mxu1 %v2936_v3  ;;  %v2956_v3 = vld [vmem:[#allocation14 + $0xa0] sm:$0xff]  }
 0x420   : > { %v1552_v7 = vpop.f32.mrb[12].mxu0 }
 0x421   : > { %v2506_v8 = vpop.f32.mrb[8].mxu1  ;;  %v2669_v9 = vpop.f32.mrb[13].mxu0 }
 0x422   : > { %v2507_v11 = vpop.f32.mrb[9].mxu1  ;;  %v1555_v12 = vpop.f32.mrb[14].mxu0 }
 0x423   : > { %v2508_v14 = vadd.f32 %v2507_v11, %v2506_v8  ;;  %v2509_v15 = vpop.f32.mrb[10].mxu1  ;;  %v2670_v16 = vpop.f32.mrb[15].mxu0  ;;  %v2385_v11 = vld [vmem:[%s3931_s28] ss:$0 sm:$0xff]  ;;  %s3190_s28 = sshll.u32 %s3286_s16, 4  ;;  %s3191_s28 = int_to_ptr.vmem [resolvable:$false] %s3190_s28 }
 0x424   : > { %v2510_v17 = vpop.f32.mrb[11].mxu1  ;;  %s3192_s1 = scalar_lea.vmem %s3191_s28, 32  ;;  %p3193_p2 = scmp.lt.s32.totalorder %s3839_s12, %s3191_s28 }
 0x425   : > { %v1512_v18 = vadd.f32 %v2508_v14, %v2360_v10  ;;  %v2511_v19 = vadd.f32 %v2510_v17, %v2509_v15  ;;  %p3194_p8 = scmp.lt.s32.totalorder %s3192_s1, %s3186_s2 }
 0x427   : > { %v1553_v22 = vadd.f32 %v1552_v7, %v1512_v18  ;;  %v1515_v23 = vadd.f32 %v2511_v19, %v2360_v10  ;;  %v2959_v7 = vld [vmem:[#allocation14 + $0xb8] sm:$0xff]   ;;  %p3195_p6 = por %p3194_p8, %p3193_p2 }
 0x429   : > { %v1559_v20 = vmax.f32 %v1553_v22, 0.0  ;;  %v1556_v24 = vadd.f32 %v1555_v12, %v1515_v23  ;;  %p3196_p10 = pnand %p3195_p6, %p3189_p0 }
 0x42b   : > { %v1560_v27 = vmax.f32 %v1556_v24, 0.0  ;;  %v1614_v28 = vrot.slane %v1559_v20, 2  ;;  %v1610_v30 = vrot.slane %v1559_v20, 1 }
 0x42d   : > { %v1615_v29 = vrot.slane %v1560_v27, 2  ;;  %v1611_v31 = vrot.slane %v1560_v27, 1  ;;  %v1618_v32 = vpack.c.bf16 %v1560_v27, %v1559_v20 }
 0x42f   : > { %v1612_v34 = vsel %vm635_vm0, %v1610_v30, %v1611_v31  ;;  %v1613_v35 = vsel %vm635_vm0, %v1611_v31, %v1610_v30  ;;  %v1616_v36 = vsel %vm640_vm1, %v1614_v28, %v1615_v29  ;;  %v1617_v37 = vsel %vm640_vm1, %v1615_v29, %v1614_v28 }
 0x430   : > { %v1619_v39 = vpack.c.bf16 %v1613_v35, %v1612_v34  ;;  %v1620_v41 = vpack.c.bf16 %v1617_v37, %v1616_v36 }
 0x432   : > { %1803 = vmatprep.mubr.bf16.mxu1 %v1619_v39  ;;  %2688 = vmatmul.mubr.bf16.vlgmr.msra.gmra.mrb[16].mxu0 %v1620_v41 }
 0x433   : > { %1804 = vmatmul.mubr.bf16.vlgmr.msra.gmra.mrb[12].mxu1 %v1618_v32  ;;  %2692 = vmatpush3.bf16.msra.mxu0 %v2952_v38  ;;  %v1917_v38 = vld [vmem:[%s3932_s30] sm:$0x1] }
 0x434   : > { %2553 = vmatpush3.bf16.msra.mxu1 %v2937_v42  ;;  %2094 = vmatprep.mubr.bf16.mxu1 %v1867_v44 }
 0x435   : > { %2554 = vmatprep.subr.bf16.mxu1 %v2938_v43  ;;  %2693 = vmatprep.subr.bf16.mxu0 %v3282_v1 }
 0x436   : > { %2707 = vmatprep.mubr.msk.bf16.mxu0 %vm3283_vm2, %v3282_v1 }
 0x437   : > { %2694 = vmatpush3.bf16.msra.mxu0 %v2953_v62 }
 0x438   : > { %2555 = vmatpush3.bf16.msra.mxu1 %v2939_v40  ;;  %2695 = vmatprep.subr.bf16.mxu0 %v3282_v1 }
 0x439   : > { %2556 = vmatprep.subr.bf16.mxu1 %v2940_v45 }
 0x43b   : > { %2696 = vmatpush3.bf16.msra.mxu0 %v2954_v63 }
 0x43c   : > { %2557 = vmatpush3.bf16.msra.mxu1 %v2941_v2  ;;  %2697 = vmatprep.subr.bf16.mxu0 %v3282_v1 }
 0x43d   : > { %2558 = vmatprep.subr.bf16.mxu1 %v2942_v47 }
 0x43f   : > { %2698 = vmatpush3.bf16.msra.mxu0 %v2955_v0 }
 0x440   : > { %2559 = vmatpush3.bf16.msra.mxu1 %v2943_v48  ;;  %2699 = vmatprep.subr.bf16.mxu0 %v3282_v1 }
 0x441   : > { %2560 = vmatprep.subr.bf16.mxu1 %v2944_v50 }
 0x443   : > { %2700 = vmatpush3.bf16.msra.mxu0 %v2956_v3 }
 0x444   : > { %2561 = vmatpush3.bf16.msra.mxu1 %v2945_v51  ;;  %2701 = vmatprep.subr.bf16.mxu0 %v3282_v1 }
 0x445   : > { %2562 = vmatprep.subr.bf16.mxu1 %v2946_v53 }
 0x447   : > { %2702 = vmatpush3.bf16.msra.mxu0 %v2957_v5 }
 0x448   : > { %2563 = vmatpush3.bf16.msra.mxu1 %v2947_v54  ;;  %2703 = vmatprep.subr.bf16.mxu0 %v3282_v1 }
 0x449   : > { %2564 = vmatprep.subr.bf16.mxu1 %v2948_v56 }
 0x44b   : > { %2704 = vmatpush3.bf16.msra.mxu0 %v2958_v6 }
 0x44c   : > { %2565 = vmatpush3.bf16.msra.mxu1 %v2949_v57  ;;  %2705 = vmatprep.subr.bf16.mxu0 %v3282_v1 }
 0x44d   : > { %2566 = vmatprep.subr.bf16.mxu1 %v2950_v58 }
 0x44f   : > { %2706 = vmatpush3.bf16.msra.mxu0 %v2959_v7 }
 0x450   : > { %2567 = vmatpush3.bf16.msra.mxu1 %v2951_v60 }
 0x453   : > { %2095 = vmatmul.mubr.bf16.vlgmr.msra.gmra.mrb[16].mxu1 %v1866_v61 }
 0x505   : > { %v1846_v8 = vpop.f32.mrb[16].mxu0 }
 0x506   : > { %v2537_v9 = vpop.f32.mrb[12].mxu1  ;;  %v2689_v10 = vpop.f32.mrb[17].mxu0 }
 0x507   : > { %v2538_v12 = vpop.f32.mrb[13].mxu1  ;;  %v1849_v13 = vpop.f32.mrb[18].mxu0 }
 0x508   : > { %v2539_v14 = vadd.f32 %v2538_v12, %v2537_v9  ;;  %v2540_v15 = vpop.f32.mrb[14].mxu1  ;;  %v2690_v16 = vpop.f32.mrb[19].mxu0 }
 0x509   : > { %v2541_v17 = vpop.f32.mrb[15].mxu1 }
 0x50a   : > { %v1806_v18 = vadd.f32 %v2539_v14, %v2385_v11  ;;  %v2542_v19 = vadd.f32 %v2541_v17, %v2540_v15 }
 0x50c   : > { %v1847_v21 = vadd.f32 %v1846_v8, %v1806_v18  ;;  %v1809_v22 = vadd.f32 %v2542_v19, %v2385_v11 }
 0x50e   : > { %v1850_v23 = vadd.f32 %v1849_v13, %v1809_v22  ;;  %v1853_v20 = vmax.f32 %v1847_v21, 0.0 }
 0x510   : > { %v1854_v1 = vmax.f32 %v1850_v23, 0.0 }
 0x512   : > { %v1858_v24 = vsel %vm1856_vm8, %v1854_v1, 0.0 }
 0x513   : > { %v1859_v26 = vmax.f32 %v1853_v20, %v1858_v24 }
 0x515   : > { %v1860_v27 = vrot.slane %v1859_v26, 4 }
 0x517   : > { %v1861_v28 = vmax.f32 %v1859_v26, %v1860_v27 }
 0x519   : > { %v1862_v29 = vrot.slane %v1861_v28, 2 }
 0x51b   : > { %v1863_v30 = vmax.f32 %v1861_v28, %v1862_v29 }
 0x51d   : > { %v1864_v31 = vrot.slane %v1863_v30, 1 }
 0x51f   : > { %v1865_v32 = vmax.f32 %v1863_v30, %v1864_v31 }
 0x521   : > { %v1868_v33 = vpack.c.bf16 %v1865_v32, %v1865_v32 }
 0x523   : > { %2708 = vmatmul.mubr.bf16.vlgmr.msra.gmra.mrb[20].mxu0 %v1868_v33 }
 0x526   : > { %v2568_v34 = vpop.f32.mrb[16].mxu1 }
 0x527   : > { %v2569_v35 = vpop.f32.mrb[17].mxu1 }
 0x528   : > { %v2570_v36 = vadd.f32 %v2569_v35, %v2568_v34  ;;  %v2571_v37 = vpop.f32.mrb[18].mxu1 }
 0x529   : > { %v2572_v4 = vpop.f32.mrb[19].mxu1 }
 0x52a   : > { %v2097_v39 = vadd.f32 %v2570_v36, %v1917_v38 }
 0x5f6   : > { %v2136_v41 = vpop.f32.mrb[20].mxu0 }
 0x5f7   : > { %v2137_v42 = vadd.f32 %v2136_v41, %v2097_v39  ;;  %v2709_v43 = vpop.f32.mrb[21].mxu0 }
 0x5f8   : > { %v2139_v44 = vpop.f32.mrb[22].mxu0 }
 0x5f9   : > { %2142 = vst [vmem:[%s613_s27] sm:$0x1] %v2137_v42  ;;  %v2710_v40 = vpop.f32.mrb[23].mxu0 }
 0x5fa   : > { %3199 = shalt.err (!%p3196_p10)
}
 0x5fb   : > { %s3200_s14 = scalar_lea.hbm %s3837_s23, 16  ;;  %s3204_s29 = scalar_lea.hbm %s3933_s17, 32 }
 0x5fc   : > { %p3201_p11 = scmp.ne.s32.totalorder %s3837_s23, %s3200_s14  ;;  %p3205_p9 = scmp.lt.u32.totalorder %s3837_s23, %s3933_s17 }
 0x5fd   : > { %p3206_p7 = scmp.lt.u32.totalorder %s3204_s29, %s3200_s14  ;;  %p3208_p12 = scmp.lt.u32.totalorder %s3200_s14, %s3837_s23 }
 0x5fe   : > { %p3202_p3 = pnand %p3201_p11, %p3934_p1 }
 0x5ff   : > { %p3207_p4 = por %p3206_p7, %p3205_p9 }
 0x600   : > { %p3203_p5 = pneg %p3202_p3 }
 0x601   : > { %p3209_p13 = por %p3208_p12, %p3207_p4 }
 0x603   : > { %p3210_p0 = pnand %p3209_p13, %p3203_p5 }
 0x605   : > { %3213 = shalt.err (!%p3210_p0)
}
 0x606   : > { %2741 = dma.vmem_to_hbm [thread:$0]  (%p3934_p1), %s3839_s12, 16, %s3837_s23, %s2144_s24  }
 0x607 PF: > { %s2168_s25 = sand.u32 1, %s3256_s18   ;;  %p3935_p2 = scmp.ne.s32.totalorder %s3916_s10, 0 }
 0x608   : > { %p3936_p8 = scmp.ge.s32.totalorder %s3268_s21, 2  ;;  %s2169_s2 = scalar_lea.sflag [#allocation4], %s2168_s25 }
 0x60a   : > { %p2770_p6 = pnand %p3936_p8, %p3935_p2 }
 0x60c   : > { %3251 = dma.done.wait (!%p2770_p6), %s2169_s2, 16  }
 0x60d   : > { %3253 = vsyncadd (!%p2770_p6), %s2169_s2, 4294967280  ;;  %p32_p10 = scmp.ge.s32.totalorder %s3582_s26, 4   ;;  %s3937_s18 = smov %s3260_s19 }
 0x60e   : > { %s3938_s19 = smov %s3264_s20  ;;  %s3939_s20 = smov %s3594_s6 }
 0x60f   : > { %s3940_s21 = smov %s3582_s26  ;;  %34 = sbr.rel (!%p32_p10) target bundleno = 18 (0x12), region = 153 }
 0x616   :  { %2173 = vsyncpa [#allocation3], 1 }
 0x617   :  { %2175 = vsyncpa [#allocation3 + $0x1], 1 }
 0x618   :  { %2176 = vsyncpa [#allocation6], 1 }
 0x619   :  { %2177 = vsyncpa [#allocation9], 1 }
 0x61a   :  { %2178 = vsyncpa [#allocation12], 1 }
 0x61b   :  { %2179 = vsyncpa [#allocation15], 1 }
 0x61c   :  { %2180 = vsyncpa [#allocation4], 1 }
 0x61d   :  { %2182 = vsyncpa [#allocation4 + $0x1], 1 }

</bundles_post_ra>
